<compile_context>
chip_gen: v7x
topology: tpu7x:2x2x1
jax: 0.10.0
libtpu: 0.0.40
codegen_flags: <defaults>
</compile_context>

<pallas_src>
import functools

import numpy as np
import jax
import jax.numpy as jnp
from jax import lax
from jax.experimental import pallas as pl
from jax.experimental.pallas import tpu as pltpu

COS_EPS = 1e-7
_VMEM_LIMIT = 64 * 1024 * 1024  # explicit budget (v7x physical = 64 MiB)


def _round_up(n, m):
    return ((n + m - 1) // m) * m


# ----------------------------------------------------------------------------
# Pallas kernels
# ----------------------------------------------------------------------------
def _prior_fused_kernel(qry_ref, sup_ref, msk_ref, wt_ref, out_ref, *, S, HW):
    """Fused prior for one batch element.

    qry_ref, sup_ref : (C, S_pad) f32   (spatial flattened on lanes, zero-padded)
    msk_ref          : (1, S_pad) f32   support mask at feature resolution
    wt_ref           : (S_pad, HW_pad)  bilinear(align_corners) resize matrix
                       (Kronecker of the two 1-D interp matrices, zero rows in pad)
    out_ref          : (2, HW_pad) f32  row0 = prior_fg, row1 = prior_ae
    """
    qry = qry_ref[...].astype(jnp.float32)            # (C, S_pad)
    sup = sup_ref[...].astype(jnp.float32)            # (C, S_pad)
    m = msk_ref[...].astype(jnp.float32)              # (1, S_pad)
    C, S_pad = qry.shape
    HW_pad = out_ref.shape[-1]

    lane = lax.broadcasted_iota(jnp.int32, (1, S_pad), 1)
    valid = lane < S                                   # (1, S_pad) bool

    # ---- Weighted_GAP: both prototypes via one MXU matmul --------------------
    m_fg = jnp.where(valid, m, 0.0)
    m_bg = jnp.where(valid, 1.0 - m, 0.0)
    masks2 = jnp.concatenate([m_fg, m_bg], axis=0)     # (2, S_pad)

    m_sum = jnp.sum(m_fg)
    fg_area = m_sum + 0.0005                           # avg_pool(mask)*h*w + 5e-4
    bg_area = (jnp.float32(S) - m_sum) + 0.0005
    row = lax.broadcasted_iota(jnp.int32, (2, 1), 0)
    inv_area = pl.reciprocal(jnp.where(row == 0, fg_area, bg_area), approx=True)

    # (2,S)·(C,S)ᵀ -> (2,C)
    protos = lax.dot_general(masks2, sup, (((1,), (1,)), ((), ())),
                             preferred_element_type=jnp.float32)
    protos = protos * inv_area                         # (2, C)
    proto_norm = jnp.sqrt(jnp.sum(protos * protos, axis=1, keepdims=True))  # (2,1)

    # ---- cosine similarity: both sims via one MXU matmul ---------------------
    ones_c = jnp.ones((1, C), jnp.float32)
    q_norm = jnp.sqrt(jnp.dot(ones_c, qry * qry,
                              preferred_element_type=jnp.float32))          # (1, S_pad)
    sims = lax.dot_general(protos, qry, (((1,), (0,)), ((), ())),
                           preferred_element_type=jnp.float32)              # (2, S_pad)
    denom = proto_norm * q_norm + COS_EPS
    sims = sims * pl.reciprocal(denom, approx=True)

    # ---- per-row min-max normalisation over the valid spatial lanes ----------
    s_min = jnp.min(jnp.where(valid, sims, jnp.inf), axis=1, keepdims=True)
    s_max = jnp.max(jnp.where(valid, sims, -jnp.inf), axis=1, keepdims=True)
    sims = (sims - s_min) * pl.reciprocal(s_max - s_min + COS_EPS, approx=True)
    sims = jnp.where(valid, sims, 0.0)                 # zero padded lanes

    # ---- bilinear align_corners resize to (H, W) as one MXU matmul -----------
    resized = jnp.dot(sims, wt_ref[...],
                      preferred_element_type=jnp.float32)                   # (2, HW_pad)
    fg_r = resized[0:1, :]
    bg_r = resized[1:2, :]

    # ---- corr = relu(fg - bg), per-batch min-max normalise --------------------
    corr = jnp.maximum(fg_r - bg_r, 0.0)
    lane_hw = lax.broadcasted_iota(jnp.int32, (1, HW_pad), 1)
    valid_hw = lane_hw < HW
    c_min = jnp.min(jnp.where(valid_hw, corr, jnp.inf), axis=1, keepdims=True)
    c_max = jnp.max(jnp.where(valid_hw, corr, -jnp.inf), axis=1, keepdims=True)
    corr = (corr - c_min) * pl.reciprocal(c_max - c_min + COS_EPS, approx=True)

    out_ref[...] = jnp.concatenate([fg_r, corr], axis=0)


def _dice_kernel(pred_ref, tgt_ref, loss_ref, inter_acc, part_acc, *, eps):
    """weighted_dice_loss per row, tiled over HW (reduction grid axis).

    pred/tgt blocks: (N, tile) f32 (padded pred lanes = -1e9 -> sigmoid == 0,
    padded tgt lanes = 0).  loss_ref: (N, 1).
    """
    k = pl.program_id(0)

    @pl.when(k == 0)
    def _():
        inter_acc[...] = jnp.zeros_like(inter_acc)
        part_acc[...] = jnp.zeros_like(part_acc)

    p = jax.nn.sigmoid(pred_ref[...].astype(jnp.float32))
    t = (tgt_ref[...] == 1.0).astype(jnp.float32)
    # t is binary -> sum(t*t) == sum(t)
    part_acc[...] += (jnp.sum(p * p, axis=1, keepdims=True)
                      + jnp.sum(t, axis=1, keepdims=True))
    inter_acc[...] += jnp.sum(t * p, axis=1, keepdims=True)

    @pl.when(k == pl.num_programs(0) - 1)
    def _():
        loss_ref[...] = 1.0 - 2.0 * inter_acc[...] * pl.reciprocal(
            jnp.maximum(part_acc[...], eps), approx=True)


# ----------------------------------------------------------------------------
# Glue: bilinear align_corners=True interpolation matrices (matches F.interpolate)
# ----------------------------------------------------------------------------
def _interp_matrix_ac(src, dst):
    W = np.zeros((dst, src), dtype=np.float32)
    if src == 1:
        W[:, 0] = 1.0
        return W
    pos = np.zeros((1,)) if dst == 1 else np.arange(dst) * (src - 1) / (dst - 1)
    lo = np.clip(np.floor(pos).astype(np.int64), 0, src - 2)
    frac = (pos - lo).astype(np.float32)
    W[np.arange(dst), lo] = 1.0 - frac
    W[np.arange(dst), lo + 1] += frac
    return W


def bilinear_resize_ac(x, out_hw):
    """x: (B, C, H, W) -> (B, C, oh, ow), bilinear, align_corners=True (XLA glue)."""
    _, _, H, W = x.shape
    oh, ow = out_hw
    Wh = jnp.asarray(_interp_matrix_ac(H, oh))
    Ww = jnp.asarray(_interp_matrix_ac(W, ow))
    return jnp.einsum('bchw,ih,jw->bcij', x, Wh, Ww)


def _resize_matrix(sp, fts_size, s_pad, hw_pad):
    """Flattened (row-major) bilinear align_corners resize matrix, (S_pad, HW_pad)."""
    H, W = fts_size
    Wh = _interp_matrix_ac(sp, H)                    # (H, sp)
    Ww = _interp_matrix_ac(sp, W)                    # (W, sp)
    full = np.einsum('ip,jq->ijpq', Wh, Ww).reshape(H * W, sp * sp)   # (HW, S)
    out = np.zeros((s_pad, hw_pad), dtype=np.float32)
    out[:sp * sp, :H * W] = full.T
    return jnp.asarray(out)


# ----------------------------------------------------------------------------
# Pallas-backed building blocks
# ----------------------------------------------------------------------------
def generate_prior_proto(qry_feat, sup_feat, sup_mask, fts_size):
    """Fused Pallas version of OneModel.generate_prior_proto (shot==1, normalize=True).

    qry_feat, sup_feat : (B, C, sp, sp)   sup_mask: (B, 1, sp, sp)
    returns prior_fg, prior_ae at fts_size, each (B, 1, H, W)
    """
    B, C, sp, _ = qry_feat.shape
    H, W = fts_size
    S, HW = sp * sp, H * W
    S_pad, HW_pad = _round_up(S, 128), _round_up(HW, 128)

    pad_s = ((0, 0), (0, 0), (0, S_pad - S))
    qry = jnp.pad(qry_feat.reshape(B, C, S).astype(jnp.float32), pad_s)
    sup = jnp.pad(sup_feat.reshape(B, C, S).astype(jnp.float32), pad_s)
    msk = jnp.pad(sup_mask.reshape(B, 1, S).astype(jnp.float32), pad_s)
    wt = _resize_matrix(sp, fts_size, S_pad, HW_pad)

    # The wt block index is constant across grid steps -> fetched once, kept
    # resident in VMEM; per-step work is three small MXU matmuls + one
    # lane-dense (2, HW_pad) store.
    out = pl.pallas_call(
        functools.partial(_prior_fused_kernel, S=S, HW=HW),
        out_shape=jax.ShapeDtypeStruct((B, 2, HW_pad), jnp.float32),
        grid=(B,),
        in_specs=[pl.BlockSpec((None, C, S_pad), lambda b: (b, 0, 0)),
                  pl.BlockSpec((None, C, S_pad), lambda b: (b, 0, 0)),
                  pl.BlockSpec((None, 1, S_pad), lambda b: (b, 0, 0)),
                  pl.BlockSpec((S_pad, HW_pad), lambda b: (0, 0))],
        out_specs=pl.BlockSpec((None, 2, HW_pad), lambda b: (b, 0, 0)),
        compiler_params=pltpu.CompilerParams(
            dimension_semantics=("parallel",),
            vmem_limit_bytes=_VMEM_LIMIT),
    )(qry, sup, msk, wt)

    prior_fg = out[:, 0, :HW].reshape(B, 1, H, W)   # fg_corr in the reference
    prior_ae = out[:, 1, :HW].reshape(B, 1, H, W)   # normalised relu(fg - bg)
    return prior_fg, prior_ae


def weighted_dice_loss(prediction, target_seg, weighted_val=1.0, reduction='sum',
                       eps=1e-8):
    """prediction, target_seg: (N, H, W).  reduction='sum' -> loss.sum()/N (as reference)."""
    n, h, w = target_seg.shape
    HW = h * w
    hw128 = _round_up(HW, 128)
    tile = min(hw128, 4096)                   # lane tiles, multiples of 128
    hw_pad = _round_up(HW, tile)

    pred = jnp.pad(prediction.reshape(n, HW).astype(jnp.float32),
                   ((0, 0), (0, hw_pad - HW)), constant_values=-1e9)  # sigmoid->0
    tgt = jnp.pad(target_seg.reshape(n, HW).astype(jnp.float32),
                  ((0, 0), (0, hw_pad - HW)), constant_values=0.0)

    per_row = pl.pallas_call(
        functools.partial(_dice_kernel, eps=eps),
        out_shape=jax.ShapeDtypeStruct((n, 1), jnp.float32),
        grid=(hw_pad // tile,),
        in_specs=[pl.BlockSpec((n, tile), lambda k: (0, k)),
                  pl.BlockSpec((n, tile), lambda k: (0, k))],
        out_specs=pl.BlockSpec((n, 1), lambda k: (0, 0)),
        scratch_shapes=[pltpu.VMEM((n, 1), jnp.float32),
                        pltpu.VMEM((n, 1), jnp.float32)],
        compiler_params=pltpu.CompilerParams(
            dimension_semantics=("arbitrary",),
            vmem_limit_bytes=_VMEM_LIMIT),
    )(pred, tgt)

    loss = per_row[:, 0] * weighted_val
    if reduction == 'sum':
        return jnp.sum(loss) / n
    elif reduction == 'mean':
        return jnp.mean(loss)
    return loss


# ----------------------------------------------------------------------------
# OneModel.forward (implementable part)
# ----------------------------------------------------------------------------
# Deterministic "parameters" from __init__ (ImageNet mean/std * 255).
_MEAN = jnp.asarray([0.485, 0.456, 0.406], jnp.float32).reshape(1, 3, 1, 1) * 255.0
_STD = jnp.asarray([0.229, 0.224, 0.225], jnp.float32).reshape(1, 3, 1, 1) * 255.0


def one_model_forward(x, s_x, s_y, y_m, qry_feat, sup_feat):
    """x: (b,3,h,w)  s_x: (b,shot,3,h,w)  s_y: (b,shot,h,w)  y_m: (b,h,w)
    qry_feat/sup_feat: (b, C, sp, sp) stand-ins for the DINOv2 last-layer features.
    Returns (output_query, priors, main_loss)."""
    b, _, h, w = x.shape

    # s_mask = s_y.clone().float(); s_mask[s_mask == 255] = 0
    s_mask = jnp.where(s_y == 255, 0.0, s_y.astype(jnp.float32))        # (b, shot, h, w)

    # DINO preprocessing (560x560 resize + backbone are TODO(synk) — external nets)
    _ = (x - _MEAN) / _STD

    # sup_mask = F.interpolate(s_mask, size=feature_size, bilinear, align_corners=True)
    # TODO(synk): multi-shot support lists are not modelled; shot == 1 path only.
    sp = qry_feat.shape[-1]
    sup_mask = bilinear_resize_ac(s_mask[:, 0:1], (sp, sp))             # (b,1,sp,sp)

    # prior_fg, _, prior_ae, _, _ = generate_prior_proto(...)   (normalize=True)
    prior_fg, prior_ae = generate_prior_proto(qry_feat, sup_feat, sup_mask, (h, w))
    # F.interpolate(prior_*, size=(h,w)) is identity here (already at (h,w)).
    priors = jnp.concatenate([prior_fg, prior_ae], axis=1)              # (b, 2, h, w)

    # TODO(synk): SAM2 memory encoder/attention, add_new_mask_batch, mem_refine and
    # propagate_in_video_batch_final are external pretrained components; stand-in
    # prediction logits = prior_fg so the WeightedDiceLoss kernel is exercised.
    output_query = prior_fg[:, 0]                                        # (b, h, w)

    main_loss = weighted_dice_loss(output_query, y_m.astype(jnp.float32))
    return output_query, priors, main_loss


# ----------------------------------------------------------------------------
if __name__ == "__main__":
    key = jax.random.PRNGKey(0)
    b, shot, h, w = 2, 1, 16, 16
    C, sp = 32, 8
    k1, k2, k3, k4, k5, k6 = jax.random.split(key, 6)

    x = jax.random.normal(k1, (b, 3, h, w), jnp.float32)
    s_x = jax.random.normal(k2, (b, shot, 3, h, w), jnp.float32)
    s_y = (jax.random.uniform(k3, (b, shot, h, w)) > 0.5).astype(jnp.float32)
    y_m = (jax.random.uniform(k4, (b, h, w)) > 0.5).astype(jnp.float32)
    # synthetic backbone features (stand-in for DINOv2 last layer / SAM2 features)
    qry_feat = jax.random.normal(k5, (b, C, sp, sp), jnp.float32)
    sup_feat = jax.random.normal(k6, (b * shot, C, sp, sp), jnp.float32)

    out_q, priors, loss = jax.jit(one_model_forward)(x, s_x, s_y, y_m, qry_feat, sup_feat)
    jax.block_until_ready((out_q, priors, loss))

    assert out_q.shape == (b, h, w)
    assert priors.shape == (b, 2, h, w)
    assert loss.shape == ()
    assert bool(jnp.isfinite(loss))
    print("KERNEL_OK")
</pallas_src>

<mosaic_0001>
module attributes {stable_mosaic.version = 11 : i64} {
  func.func @_prior_fused_kernel(%arg0: i32, %arg1: memref<1x32x128xf32, #tpu.memory_space<vmem>>, %arg2: memref<1x32x128xf32, #tpu.memory_space<vmem>>, %arg3: memref<1x1x128xf32, #tpu.memory_space<vmem>>, %arg4: memref<128x256xf32, #tpu.memory_space<vmem>>, %arg5: memref<1x2x256xf32, #tpu.memory_space<vmem>>) attributes {dimension_semantics = [#tpu.dimension_semantics<parallel>], iteration_bounds = array<i64: 2>, scalar_prefetch = 0 : i64, scratch_operands = 0 : i64, tpu.core_type = #tpu.core_type<tc>, window_params = [{transform_indices = @transform_0, window_bounds = array<i64: 1, 32, 128>}, {transform_indices = @transform_1, window_bounds = array<i64: 1, 32, 128>}, {transform_indices = @transform_2, window_bounds = array<i64: 1, 1, 128>}, {pipeline_mode = #tpu.pipeline_mode<synchronous>, transform_indices = @transform_3, window_bounds = array<i64: 128, 256>}, {transform_indices = @transform_4, window_bounds = array<i64: 1, 2, 256>}]} {
    %c0 = arith.constant 0 : index
    %c0_0 = arith.constant 0 : index
    %c0_1 = arith.constant 0 : index
    %0 = vector.load %arg1[%c0, %c0_0, %c0_1] : memref<1x32x128xf32, #tpu.memory_space<vmem>>, vector<1x32x128xf32>
    %1 = vector.shape_cast %0 : vector<1x32x128xf32> to vector<32x128xf32>
    %c0_2 = arith.constant 0 : index
    %c0_3 = arith.constant 0 : index
    %c0_4 = arith.constant 0 : index
    %2 = vector.load %arg2[%c0_2, %c0_3, %c0_4] : memref<1x32x128xf32, #tpu.memory_space<vmem>>, vector<1x32x128xf32>
    %3 = vector.shape_cast %2 : vector<1x32x128xf32> to vector<32x128xf32>
    %c0_5 = arith.constant 0 : index
    %c0_6 = arith.constant 0 : index
    %c0_7 = arith.constant 0 : index
    %4 = vector.load %arg3[%c0_5, %c0_6, %c0_7] : memref<1x1x128xf32, #tpu.memory_space<vmem>>, vector<1x1x128xf32>
    %5 = vector.shape_cast %4 : vector<1x1x128xf32> to vector<1x128xf32>
    %6 = tpu.iota {dimensions = array<i32: 1>} : vector<1x128xi32>
    %c64_i32 = arith.constant 64 : i32
    %7 = vector.broadcast %c64_i32 : i32 to vector<1x128xi32>
    %8 = arith.cmpi slt, %6, %7 : vector<1x128xi32>
    %cst = arith.constant 0.000000e+00 : f32
    %9 = vector.broadcast %cst : f32 to vector<1x128xf32>
    %10 = arith.select %8, %5, %9 : vector<1x128xi1>, vector<1x128xf32>
    %cst_8 = arith.constant 1.000000e+00 : f32
    %11 = vector.broadcast %cst_8 : f32 to vector<1x128xf32>
    %12 = arith.subf %11, %5 : vector<1x128xf32>
    %cst_9 = arith.constant 0.000000e+00 : f32
    %13 = vector.broadcast %cst_9 : f32 to vector<1x128xf32>
    %14 = arith.select %8, %12, %13 : vector<1x128xi1>, vector<1x128xf32>
    %15 = tpu.concatenate %10, %14 in 0 : vector<1x128xf32>, vector<1x128xf32> -> vector<2x128xf32>
    %16 = vector.shape_cast %10 : vector<1x128xf32> to vector<1x1x128xf32>
    %cst_10 = arith.constant dense<0.000000e+00> : vector<1xf32>
    %17 = vector.multi_reduction <add>, %16, %cst_10 [1, 2] : vector<1x1x128xf32> to vector<1xf32>
    %18 = vector.shape_cast %17 : vector<1xf32> to vector<1x1x1xf32>
    %19 = vector.extract %18[0, 0, 0] : f32 from vector<1x1x1xf32>
    %cst_11 = arith.constant 5.000000e-04 : f32
    %20 = arith.addf %19, %cst_11 : f32
    %cst_12 = arith.constant 6.400000e+01 : f32
    %21 = arith.subf %cst_12, %19 : f32
    %cst_13 = arith.constant 5.000000e-04 : f32
    %22 = arith.addf %21, %cst_13 : f32
    %23 = tpu.iota {dimensions = array<i32: 0>} : vector<2x1xi32>
    %c0_i32 = arith.constant 0 : i32
    %24 = vector.broadcast %c0_i32 : i32 to vector<2x1xi32>
    %25 = arith.cmpi eq, %23, %24 : vector<2x1xi32>
    %26 = vector.broadcast %20 : f32 to vector<2x1xf32>
    %27 = vector.broadcast %22 : f32 to vector<2x1xf32>
    %28 = arith.select %25, %26, %27 : vector<2x1xi1>, vector<2x1xf32>
    %29 = tpu.reciprocal %28 {approx = true} : vector<2x1xf32> -> vector<2x1xf32>
    %cst_14 = arith.constant dense<0.000000e+00> : vector<2x32xf32>
    %30 = tpu.matmul %15, %3, %cst_14 {dimension_numbers = #tpu.dot_dimension_numbers<[1], [1], [0], [0], [0, 0, 1, 0], [], []>} : vector<2x128xf32>, vector<32x128xf32>, vector<2x32xf32> -> vector<2x32xf32>
    %31 = vector.broadcast %29 : vector<2x1xf32> to vector<2x32xf32>
    %32 = arith.mulf %30, %31 : vector<2x32xf32>
    %33 = arith.mulf %32, %32 : vector<2x32xf32>
    %cst_15 = arith.constant dense<0.000000e+00> : vector<2xf32>
    %34 = vector.multi_reduction <add>, %33, %cst_15 [1] : vector<2x32xf32> to vector<2xf32>
    %35 = vector.shape_cast %34 : vector<2xf32> to vector<2x1xf32>
    %36 = math.sqrt %35 : vector<2x1xf32>
    %cst_16 = arith.constant 1.000000e+00 : f32
    %37 = vector.broadcast %cst_16 : f32 to vector<1x32xf32>
    %38 = arith.mulf %1, %1 : vector<32x128xf32>
    %cst_17 = arith.constant dense<0.000000e+00> : vector<1x128xf32>
    %39 = tpu.matmul %37, %38, %cst_17 {dimension_numbers = #tpu.dot_dimension_numbers<[1], [0], [0], [1], [0, 0, 1, 1], [], []>} : vector<1x32xf32>, vector<32x128xf32>, vector<1x128xf32> -> vector<1x128xf32>
    %40 = math.sqrt %39 : vector<1x128xf32>
    %cst_18 = arith.constant dense<0.000000e+00> : vector<2x128xf32>
    %41 = tpu.matmul %32, %1, %cst_18 {dimension_numbers = #tpu.dot_dimension_numbers<[1], [0], [0], [1], [0, 0, 1, 1], [], []>} : vector<2x32xf32>, vector<32x128xf32>, vector<2x128xf32> -> vector<2x128xf32>
    %42 = vector.broadcast %36 : vector<2x1xf32> to vector<2x128xf32>
    %43 = vector.broadcast %40 : vector<1x128xf32> to vector<2x128xf32>
    %44 = arith.mulf %42, %43 : vector<2x128xf32>
    %cst_19 = arith.constant 1.000000e-07 : f32
    %45 = vector.broadcast %cst_19 : f32 to vector<2x128xf32>
    %46 = arith.addf %44, %45 : vector<2x128xf32>
    %47 = tpu.reciprocal %46 {approx = true} : vector<2x128xf32> -> vector<2x128xf32>
    %48 = arith.mulf %41, %47 : vector<2x128xf32>
    %cst_20 = arith.constant 0x7F800000 : f32
    %49 = vector.shape_cast %8 : vector<1x128xi1> to vector<1x128xi1>
    %50 = vector.broadcast %49 : vector<1x128xi1> to vector<2x128xi1>
    %51 = vector.broadcast %cst_20 : f32 to vector<2x128xf32>
    %52 = arith.select %50, %48, %51 : vector<2x128xi1>, vector<2x128xf32>
    %cst_21 = arith.constant dense<0x7F800000> : vector<2xf32>
    %53 = vector.multi_reduction <minimumf>, %52, %cst_21 [1] : vector<2x128xf32> to vector<2xf32>
    %54 = vector.shape_cast %53 : vector<2xf32> to vector<2x1xf32>
    %cst_22 = arith.constant 0xFF800000 : f32
    %55 = vector.shape_cast %8 : vector<1x128xi1> to vector<1x128xi1>
    %56 = vector.broadcast %55 : vector<1x128xi1> to vector<2x128xi1>
    %57 = vector.broadcast %cst_22 : f32 to vector<2x128xf32>
    %58 = arith.select %56, %48, %57 : vector<2x128xi1>, vector<2x128xf32>
    %cst_23 = arith.constant dense<0xFF800000> : vector<2xf32>
    %59 = vector.multi_reduction <maximumf>, %58, %cst_23 [1] : vector<2x128xf32> to vector<2xf32>
    %60 = vector.shape_cast %59 : vector<2xf32> to vector<2x1xf32>
    %61 = vector.broadcast %54 : vector<2x1xf32> to vector<2x128xf32>
    %62 = arith.subf %48, %61 : vector<2x128xf32>
    %63 = arith.subf %60, %54 : vector<2x1xf32>
    %cst_24 = arith.constant 1.000000e-07 : f32
    %64 = vector.broadcast %cst_24 : f32 to vector<2x1xf32>
    %65 = arith.addf %63, %64 : vector<2x1xf32>
    %66 = tpu.reciprocal %65 {approx = true} : vector<2x1xf32> -> vector<2x1xf32>
    %67 = vector.broadcast %66 : vector<2x1xf32> to vector<2x128xf32>
    %68 = arith.mulf %62, %67 : vector<2x128xf32>
    %cst_25 = arith.constant 0.000000e+00 : f32
    %69 = vector.shape_cast %8 : vector<1x128xi1> to vector<1x128xi1>
    %70 = vector.broadcast %69 : vector<1x128xi1> to vector<2x128xi1>
    %71 = vector.broadcast %cst_25 : f32 to vector<2x128xf32>
    %72 = arith.select %70, %68, %71 : vector<2x128xi1>, vector<2x128xf32>
    %c0_26 = arith.constant 0 : index
    %c0_27 = arith.constant 0 : index
    %73 = vector.load %arg4[%c0_26, %c0_27] : memref<128x256xf32, #tpu.memory_space<vmem>>, vector<128x256xf32>
    %cst_28 = arith.constant dense<0.000000e+00> : vector<2x256xf32>
    %74 = tpu.matmul %72, %73, %cst_28 {dimension_numbers = #tpu.dot_dimension_numbers<[1], [0], [0], [1], [0, 0, 1, 1], [], []>} : vector<2x128xf32>, vector<128x256xf32>, vector<2x256xf32> -> vector<2x256xf32>
    %75 = vector.extract_strided_slice %74 {offsets = [0, 0], sizes = [1, 256], strides = [1, 1]} : vector<2x256xf32> to vector<1x256xf32>
    %76 = vector.extract_strided_slice %74 {offsets = [1, 0], sizes = [1, 256], strides = [1, 1]} : vector<2x256xf32> to vector<1x256xf32>
    %77 = arith.subf %75, %76 : vector<1x256xf32>
    %cst_29 = arith.constant 0.000000e+00 : f32
    %78 = vector.broadcast %cst_29 : f32 to vector<1x256xf32>
    %79 = arith.maximumf %77, %78 : vector<1x256xf32>
    %80 = tpu.iota {dimensions = array<i32: 1>} : vector<1x256xi32>
    %c256_i32 = arith.constant 256 : i32
    %81 = vector.broadcast %c256_i32 : i32 to vector<1x256xi32>
    %82 = arith.cmpi slt, %80, %81 : vector<1x256xi32>
    %cst_30 = arith.constant 0x7F800000 : f32
    %83 = vector.broadcast %cst_30 : f32 to vector<1x256xf32>
    %84 = arith.select %82, %79, %83 : vector<1x256xi1>, vector<1x256xf32>
    %cst_31 = arith.constant dense<0x7F800000> : vector<1xf32>
    %85 = vector.multi_reduction <minimumf>, %84, %cst_31 [1] : vector<1x256xf32> to vector<1xf32>
    %86 = vector.shape_cast %85 : vector<1xf32> to vector<1x1xf32>
    %cst_32 = arith.constant 0xFF800000 : f32
    %87 = vector.broadcast %cst_32 : f32 to vector<1x256xf32>
    %88 = arith.select %82, %79, %87 : vector<1x256xi1>, vector<1x256xf32>
    %cst_33 = arith.constant dense<0xFF800000> : vector<1xf32>
    %89 = vector.multi_reduction <maximumf>, %88, %cst_33 [1] : vector<1x256xf32> to vector<1xf32>
    %90 = vector.shape_cast %89 : vector<1xf32> to vector<1x1xf32>
    %91 = vector.broadcast %86 : vector<1x1xf32> to vector<1x256xf32>
    %92 = arith.subf %79, %91 : vector<1x256xf32>
    %93 = arith.subf %90, %86 : vector<1x1xf32>
    %cst_34 = arith.constant 1.000000e-07 : f32
    %94 = vector.broadcast %cst_34 : f32 to vector<1x1xf32>
    %95 = arith.addf %93, %94 : vector<1x1xf32>
    %96 = tpu.reciprocal %95 {approx = true} : vector<1x1xf32> -> vector<1x1xf32>
    %97 = vector.broadcast %96 : vector<1x1xf32> to vector<1x256xf32>
    %98 = arith.mulf %92, %97 : vector<1x256xf32>
    %99 = tpu.concatenate %75, %98 in 0 : vector<1x256xf32>, vector<1x256xf32> -> vector<2x256xf32>
    %c0_35 = arith.constant 0 : index
    %c0_36 = arith.constant 0 : index
    %c0_37 = arith.constant 0 : index
    %100 = vector.load %arg5[%c0_35, %c0_36, %c0_37] : memref<1x2x256xf32, #tpu.memory_space<vmem>>, vector<1x2x256xf32>
    %101 = vector.shape_cast %100 : vector<1x2x256xf32> to vector<2x256xf32>
    %102 = vector.shape_cast %99 : vector<2x256xf32> to vector<1x2x256xf32>
    tpu.vector_store %arg5[%c0_35, %c0_36, %c0_37], %102 {strides = array<i32>} : memref<1x2x256xf32, #tpu.memory_space<vmem>>, vector<1x2x256xf32>,
    return
  }
  func.func @transform_0(%arg0: i32) -> (i32, i32, i32) {
    %c0_i32 = arith.constant 0 : i32
    %c0_i32_0 = arith.constant 0 : i32
    %c0_i32_1 = arith.constant 0 : i32
    return %arg0, %c0_i32, %c0_i32_0 : i32, i32, i32
  }
  func.func @transform_1(%arg0: i32) -> (i32, i32, i32) {
    %c0_i32 = arith.constant 0 : i32
    %c0_i32_0 = arith.constant 0 : i32
    %c0_i32_1 = arith.constant 0 : i32
    return %arg0, %c0_i32, %c0_i32_0 : i32, i32, i32
  }
  func.func @transform_2(%arg0: i32) -> (i32, i32, i32) {
    %c0_i32 = arith.constant 0 : i32
    %c0_i32_0 = arith.constant 0 : i32
    %c0_i32_1 = arith.constant 0 : i32
    return %arg0, %c0_i32, %c0_i32_0 : i32, i32, i32
  }
  func.func @transform_3(%arg0: i32) -> (i32, i32) {
    %c0_i32 = arith.constant 0 : i32
    %c0_i32_0 = arith.constant 0 : i32
    %c0_i32_1 = arith.constant 0 : i32
    return %c0_i32, %c0_i32_0 : i32, i32
  }
  func.func @transform_4(%arg0: i32) -> (i32, i32, i32) {
    %c0_i32 = arith.constant 0 : i32
    %c0_i32_0 = arith.constant 0 : i32
    %c0_i32_1 = arith.constant 0 : i32
    return %arg0, %c0_i32, %c0_i32_0 : i32, i32, i32
  }
}

module attributes {stable_mosaic.version = 11 : i64} {
  func.func @_dice_kernel(%arg0: i32, %arg1: memref<2x256xf32, #tpu.memory_space<vmem>>, %arg2: memref<2x256xf32, #tpu.memory_space<vmem>>, %arg3: memref<2x1xf32, #tpu.memory_space<vmem>>, %arg4: memref<2x1xf32, #tpu.memory_space<vmem>>, %arg5: memref<2x1xf32, #tpu.memory_space<vmem>>) attributes {dimension_semantics = [#tpu.dimension_semantics<arbitrary>], iteration_bounds = array<i64: 1>, scalar_prefetch = 0 : i64, scratch_operands = 2 : i64, tpu.core_type = #tpu.core_type<tc>, window_params = [{transform_indices = @transform_0, window_bounds = array<i64: 2, 256>}, {transform_indices = @transform_1, window_bounds = array<i64: 2, 256>}, {pipeline_mode = #tpu.pipeline_mode<synchronous>, transform_indices = @transform_2, window_bounds = array<i64: 2, 1>}]} {
    %c0_i32 = arith.constant 0 : i32
    %0 = arith.cmpi eq, %arg0, %c0_i32 : i32
    %1 = arith.extui %0 : i1 to i32
    %c0_i32_0 = arith.constant 0 : i32
    %2 = arith.cmpi ne, %1, %c0_i32_0 : i32
    scf.if %2 {
      %cst_18 = arith.constant 0.000000e+00 : f32
      %32 = vector.broadcast %cst_18 : f32 to vector<2x1xf32>
      %c0_19 = arith.constant 0 : index
      %c0_20 = arith.constant 0 : index
      %33 = vector.load %arg4[%c0_19, %c0_20] : memref<2x1xf32, #tpu.memory_space<vmem>>, vector<2x1xf32>
      tpu.vector_store %arg4[%c0_19, %c0_20], %32 {strides = array<i32>} : memref<2x1xf32, #tpu.memory_space<vmem>>, vector<2x1xf32>,
      %cst_21 = arith.constant 0.000000e+00 : f32
      %34 = vector.broadcast %cst_21 : f32 to vector<2x1xf32>
      %c0_22 = arith.constant 0 : index
      %c0_23 = arith.constant 0 : index
      %35 = vector.load %arg5[%c0_22, %c0_23] : memref<2x1xf32, #tpu.memory_space<vmem>>, vector<2x1xf32>
      tpu.vector_store %arg5[%c0_22, %c0_23], %34 {strides = array<i32>} : memref<2x1xf32, #tpu.memory_space<vmem>>, vector<2x1xf32>,
    } else {
    }
    %c0 = arith.constant 0 : index
    %c0_1 = arith.constant 0 : index
    %3 = vector.load %arg1[%c0, %c0_1] : memref<2x256xf32, #tpu.memory_space<vmem>>, vector<2x256xf32>
    %4 = arith.negf %3 : vector<2x256xf32>
    %5 = math.exp %4 : vector<2x256xf32>
    %cst = arith.constant 1.000000e+00 : f32
    %6 = vector.broadcast %cst : f32 to vector<2x256xf32>
    %7 = arith.addf %6, %5 : vector<2x256xf32>
    %8 = arith.divf %6, %7 : vector<2x256xf32>
    %c0_2 = arith.constant 0 : index
    %c0_3 = arith.constant 0 : index
    %9 = vector.load %arg2[%c0_2, %c0_3] : memref<2x256xf32, #tpu.memory_space<vmem>>, vector<2x256xf32>
    %cst_4 = arith.constant 1.000000e+00 : f32
    %10 = vector.broadcast %cst_4 : f32 to vector<2x256xf32>
    %11 = arith.cmpf oeq, %9, %10 : vector<2x256xf32>
    %12 = arith.extui %11 : vector<2x256xi1> to vector<2x256xi32>
    %13 = arith.sitofp %12 : vector<2x256xi32> to vector<2x256xf32>
    %c0_5 = arith.constant 0 : index
    %c0_6 = arith.constant 0 : index
    %14 = vector.load %arg5[%c0_5, %c0_6] : memref<2x1xf32, #tpu.memory_space<vmem>>, vector<2x1xf32>
    %15 = arith.mulf %8, %8 : vector<2x256xf32>
    %cst_7 = arith.constant dense<0.000000e+00> : vector<2xf32>
    %16 = vector.multi_reduction <add>, %15, %cst_7 [1] : vector<2x256xf32> to vector<2xf32>
    %17 = vector.shape_cast %16 : vector<2xf32> to vector<2x1xf32>
    %cst_8 = arith.constant dense<0.000000e+00> : vector<2xf32>
    %18 = vector.multi_reduction <add>, %13, %cst_8 [1] : vector<2x256xf32> to vector<2xf32>
    %19 = vector.shape_cast %18 : vector<2xf32> to vector<2x1xf32>
    %20 = arith.addf %17, %19 : vector<2x1xf32>
    %21 = arith.addf %14, %20 : vector<2x1xf32>
    %c0_9 = arith.constant 0 : index
    %c0_10 = arith.constant 0 : index
    %22 = vector.load %arg5[%c0_9, %c0_10] : memref<2x1xf32, #tpu.memory_space<vmem>>, vector<2x1xf32>
    tpu.vector_store %arg5[%c0_9, %c0_10], %21 {strides = array<i32>} : memref<2x1xf32, #tpu.memory_space<vmem>>, vector<2x1xf32>,
    %c0_11 = arith.constant 0 : index
    %c0_12 = arith.constant 0 : index
    %23 = vector.load %arg4[%c0_11, %c0_12] : memref<2x1xf32, #tpu.memory_space<vmem>>, vector<2x1xf32>
    %24 = arith.mulf %13, %8 : vector<2x256xf32>
    %cst_13 = arith.constant dense<0.000000e+00> : vector<2xf32>
    %25 = vector.multi_reduction <add>, %24, %cst_13 [1] : vector<2x256xf32> to vector<2xf32>
    %26 = vector.shape_cast %25 : vector<2xf32> to vector<2x1xf32>
    %27 = arith.addf %23, %26 : vector<2x1xf32>
    %c0_14 = arith.constant 0 : index
    %c0_15 = arith.constant 0 : index
    %28 = vector.load %arg4[%c0_14, %c0_15] : memref<2x1xf32, #tpu.memory_space<vmem>>, vector<2x1xf32>
    tpu.vector_store %arg4[%c0_14, %c0_15], %27 {strides = array<i32>} : memref<2x1xf32, #tpu.memory_space<vmem>>, vector<2x1xf32>,
    %c0_i32_16 = arith.constant 0 : i32
    %29 = arith.cmpi eq, %arg0, %c0_i32_16 : i32
    %30 = arith.extui %29 : i1 to i32
    %c0_i32_17 = arith.constant 0 : i32
    %31 = arith.cmpi ne, %30, %c0_i32_17 : i32
    scf.if %31 {
      %c0_18 = arith.constant 0 : index
      %c0_19 = arith.constant 0 : index
      %32 = vector.load %arg4[%c0_18, %c0_19] : memref<2x1xf32, #tpu.memory_space<vmem>>, vector<2x1xf32>
      %cst_20 = arith.constant 2.000000e+00 : f32
      %33 = vector.broadcast %cst_20 : f32 to vector<2x1xf32>
      %34 = arith.mulf %33, %32 : vector<2x1xf32>
      %c0_21 = arith.constant 0 : index
      %c0_22 = arith.constant 0 : index
      %35 = vector.load %arg5[%c0_21, %c0_22] : memref<2x1xf32, #tpu.memory_space<vmem>>, vector<2x1xf32>
      %cst_23 = arith.constant 9.99999993E-9 : f32
      %36 = vector.broadcast %cst_23 : f32 to vector<2x1xf32>
      %37 = arith.maximumf %35, %36 : vector<2x1xf32>
      %38 = tpu.reciprocal %37 {approx = true} : vector<2x1xf32> -> vector<2x1xf32>
      %39 = arith.mulf %34, %38 : vector<2x1xf32>
      %cst_24 = arith.constant 1.000000e+00 : f32
      %40 = vector.broadcast %cst_24 : f32 to vector<2x1xf32>
      %41 = arith.subf %40, %39 : vector<2x1xf32>
      %c0_25 = arith.constant 0 : index
      %c0_26 = arith.constant 0 : index
      %42 = vector.load %arg3[%c0_25, %c0_26] : memref<2x1xf32, #tpu.memory_space<vmem>>, vector<2x1xf32>
      tpu.vector_store %arg3[%c0_25, %c0_26], %41 {strides = array<i32>} : memref<2x1xf32, #tpu.memory_space<vmem>>, vector<2x1xf32>,
    } else {
    }
    return
  }
  func.func @transform_0(%arg0: i32) -> (i32, i32) {
    %c0_i32 = arith.constant 0 : i32
    %c0_i32_0 = arith.constant 0 : i32
    return %c0_i32, %arg0 : i32, i32
  }
  func.func @transform_1(%arg0: i32) -> (i32, i32) {
    %c0_i32 = arith.constant 0 : i32
    %c0_i32_0 = arith.constant 0 : i32
    return %c0_i32, %arg0 : i32, i32
  }
  func.func @transform_2(%arg0: i32) -> (i32, i32) {
    %c0_i32 = arith.constant 0 : i32
    %c0_i32_0 = arith.constant 0 : i32
    %c0_i32_1 = arith.constant 0 : i32
    return %c0_i32, %c0_i32_0 : i32, i32
  }
}

</mosaic_0001>

<bundles_post_ra>
// kernel: squeeze.5
= control target key start
LH: loop header
LB: loop body
LE: loop exit
PB: predicated region body
PF: predicated region fallthrough
CT: control target
= control target key end

     0   :  { %vm11_vm0 = vcmask 130048   ;;  %s77_s10 = smov 80   ;;  %s78_s15 = smov 96   ;;  %s135_s0 = inlined_call_operand.vmem [shape: f32[2,1,256], index: 0, kind: input, shape index: {}]   ;;  %s136_s1 = inlined_call_operand.vmem [shape: f32[2,1,16,16], index: 1, kind: output, shape index: {}]  }
   0x1   :  { %v60_v0 = vld [vmem:[%s135_s0 + $0x2] sm:$0x3]  ;;  %v8_v1 = vld [vmem:[%s135_s0] sm:$0x3]  ;;  %s76_s0 = smov 112   ;;  %s79_s16 = smov 64  }
   0x2   :  { %7 = vst [vmem:[#allocation0 + $0x8] sm:$0x3] %v60_v0  ;;  %9 = vst [vmem:[#allocation0] sm:$0x3] %v8_v1  ;;  %s80_s17 = smov 48   ;;  %s81_s18 = smov 32  }
   0x3   :  { %s82_s19 = smov 16  }
   0x9   :  { %v18_v2 = vld.sshfl [vmem:[#allocation0] sm:$0xff pattern:$0x99999180]  }
   0xa   :  { %v10_v3 = vld [vmem:[#allocation0] sm:$0x3]   ;;  %19 = vrot.lane.b32.xlu0 %v18_v2, %s76_s0  ;;  %31 = vrot.lane.b32.xlu1 %v18_v2, %s77_s10  ;;  %v14_v4 = vld [vmem:[#allocation0 + $0x8] sm:$0x3]  }
   0xb   :  { %12 = vst.msk [vmem:[%s136_s1] ss:$16 sm:$0x3] %vm11_vm0, %v10_v3   ;;  %61 = vst.msk [vmem:[%s136_s1 + $0x8] ss:$16 sm:$0x3] %vm11_vm0, %v14_v4  }
   0xe   :  { %25 = vrot.lane.b32.xlu0 %v18_v2, %s78_s15  ;;  %37 = vrot.lane.b32.xlu1 %v18_v2, %s79_s16 }
  0x12   :  { %43 = vrot.lane.b32.xlu0 %v18_v2, %s80_s17  ;;  %49 = vrot.lane.b32.xlu1 %v18_v2, %s81_s18 }
  0x16   :  { %55 = vrot.lane.b32.xlu0 %v18_v2, %s82_s19 }
  0x7c   :  { %v20_v5 = vpop.permute.xlu0 %19   ;;  %v32_v6 = vpop.permute.xlu1 %31  }
  0x7d   :  { %62 = vst.msk [vmem:[%s136_s1 + $0x1] ss:$8 sm:$0xf] %vm11_vm0, %v20_v5   ;;  %64 = vst.msk [vmem:[%s136_s1 + $0x3] ss:$8 sm:$0xf] %vm11_vm0, %v32_v6  }
  0x80   :  { %v26_v7 = vpop.permute.xlu0 %25   ;;  %v38_v8 = vpop.permute.xlu1 %37  }
  0x81   :  { %63 = vst.msk [vmem:[%s136_s1 + $0x2] ss:$8 sm:$0xf] %vm11_vm0, %v26_v7   ;;  %65 = vst.msk [vmem:[%s136_s1 + $0x4] ss:$8 sm:$0xf] %vm11_vm0, %v38_v8  }
  0x84   :  { %v44_v9 = vpop.permute.xlu0 %43   ;;  %v50_v10 = vpop.permute.xlu1 %49  }
  0x85   :  { %66 = vst.msk [vmem:[%s136_s1 + $0x5] ss:$8 sm:$0xf] %vm11_vm0, %v44_v9   ;;  %67 = vst.msk [vmem:[%s136_s1 + $0x6] ss:$8 sm:$0xf] %vm11_vm0, %v50_v10  }
  0x88   :  { %v56_v11 = vpop.permute.xlu0 %55  }
  0x89   :  { %68 = vst.msk [vmem:[%s136_s1 + $0x7] ss:$8 sm:$0xf] %vm11_vm0, %v56_v11  }

// kernel: squeeze.6
= control target key start
LH: loop header
LB: loop body
LE: loop exit
PB: predicated region body
PF: predicated region fallthrough
CT: control target
= control target key end

     0   :  { %vm11_vm0 = vcmask 130048   ;;  %s77_s10 = smov 80   ;;  %s78_s15 = smov 96   ;;  %s135_s0 = inlined_call_operand.vmem [shape: f32[2,256], index: 0, kind: input, shape index: {}]   ;;  %s136_s1 = inlined_call_operand.vmem [shape: f32[2,1,16,16], index: 1, kind: output, shape index: {}]  }
   0x1   :  { %v60_v0 = vld [vmem:[%s135_s0 + $0x2] sm:$0x3]  ;;  %v8_v1 = vld [vmem:[%s135_s0] sm:$0x3]  ;;  %s76_s0 = smov 112   ;;  %s79_s16 = smov 64  }
   0x2   :  { %7 = vst [vmem:[#allocation0 + $0x8] sm:$0x3] %v60_v0  ;;  %9 = vst [vmem:[#allocation0] sm:$0x3] %v8_v1  ;;  %s80_s17 = smov 48   ;;  %s81_s18 = smov 32  }
   0x3   :  { %s82_s19 = smov 16  }
   0x9   :  { %v18_v2 = vld.sshfl [vmem:[#allocation0] sm:$0xff pattern:$0x99999180]  }
   0xa   :  { %v10_v3 = vld [vmem:[#allocation0] sm:$0x3]   ;;  %19 = vrot.lane.b32.xlu0 %v18_v2, %s76_s0  ;;  %31 = vrot.lane.b32.xlu1 %v18_v2, %s77_s10  ;;  %v14_v4 = vld [vmem:[#allocation0 + $0x8] sm:$0x3]  }
   0xb   :  { %12 = vst.msk [vmem:[%s136_s1] ss:$16 sm:$0x3] %vm11_vm0, %v10_v3   ;;  %61 = vst.msk [vmem:[%s136_s1 + $0x8] ss:$16 sm:$0x3] %vm11_vm0, %v14_v4  }
   0xe   :  { %25 = vrot.lane.b32.xlu0 %v18_v2, %s78_s15  ;;  %37 = vrot.lane.b32.xlu1 %v18_v2, %s79_s16 }
  0x12   :  { %43 = vrot.lane.b32.xlu0 %v18_v2, %s80_s17  ;;  %49 = vrot.lane.b32.xlu1 %v18_v2, %s81_s18 }
  0x16   :  { %55 = vrot.lane.b32.xlu0 %v18_v2, %s82_s19 }
  0x7c   :  { %v20_v5 = vpop.permute.xlu0 %19   ;;  %v32_v6 = vpop.permute.xlu1 %31  }
  0x7d   :  { %62 = vst.msk [vmem:[%s136_s1 + $0x1] ss:$8 sm:$0xf] %vm11_vm0, %v20_v5   ;;  %64 = vst.msk [vmem:[%s136_s1 + $0x3] ss:$8 sm:$0xf] %vm11_vm0, %v32_v6  }
  0x80   :  { %v26_v7 = vpop.permute.xlu0 %25   ;;  %v38_v8 = vpop.permute.xlu1 %37  }
  0x81   :  { %63 = vst.msk [vmem:[%s136_s1 + $0x2] ss:$8 sm:$0xf] %vm11_vm0, %v26_v7   ;;  %65 = vst.msk [vmem:[%s136_s1 + $0x4] ss:$8 sm:$0xf] %vm11_vm0, %v38_v8  }
  0x84   :  { %v44_v9 = vpop.permute.xlu0 %43   ;;  %v50_v10 = vpop.permute.xlu1 %49  }
  0x85   :  { %66 = vst.msk [vmem:[%s136_s1 + $0x5] ss:$8 sm:$0xf] %vm11_vm0, %v44_v9   ;;  %67 = vst.msk [vmem:[%s136_s1 + $0x6] ss:$8 sm:$0xf] %vm11_vm0, %v50_v10  }
  0x88   :  { %v56_v11 = vpop.permute.xlu0 %55  }
  0x89   :  { %68 = vst.msk [vmem:[%s136_s1 + $0x7] ss:$8 sm:$0xf] %vm11_vm0, %v56_v11  }

// kernel: squeeze.7
= control target key start
LH: loop header
LB: loop body
LE: loop exit
PB: predicated region body
PF: predicated region fallthrough
CT: control target
= control target key end

     0   :  { %s149_s0 = inlined_call_operand.vmem [shape: f32[2,1,256], index: 0, kind: input, shape index: {}]   ;;  %s150_s1 = inlined_call_operand.hbm [shape: f32[2,16,16], index: 1, kind: output, shape index: {}]  }
   0x1   :  { %v71_v0 = vld [vmem:[%s149_s0 + $0x2] sm:$0x3]  ;;  %v9_v1 = vld [vmem:[%s149_s0] sm:$0x3] }
   0x2   :  { %8 = vst [vmem:[#allocation2 + $0x8] sm:$0x3] %v71_v0  ;;  %10 = vst [vmem:[#allocation2] sm:$0x3] %v9_v1 }
   0x3   :  { %2 = vsyncpa [#allocation1], 0  ;;  %vm12_vm0 = vcmask 130048   ;;  %s104_s0 = smov 112   ;;  %s105_s10 = smov 80  }
   0x4   :  { %s106_s11 = smov 96   ;;  %s107_s12 = smov 64  }
   0x5   :  { %s108_s13 = smov 48   ;;  %s109_s14 = smov 32  }
   0x6   :  { %s110_s15 = smov 16   ;;  %s111_s16 = smov [#allocation0]  }
   0x7   :  { %s65_s17 = sshll.u32 %s111_s16, 4  ;;  %s66_s17 = int_to_ptr.vmem [resolvable:$true] %s65_s17 }
   0x8   :  { %s80_s18 = scalar_lea.vmem %s66_s17, 512  ;;  %p85_p1 = scmp.lt.s32.totalorder %s66_s17, %s66_s17 }
   0x9   :  { %v19_v2 = vld.sshfl [vmem:[#allocation2] sm:$0xff pattern:$0x99999180]   ;;  %p81_p0 = scmp.ne.s32.totalorder %s66_s17, %s80_s18  ;;  %p86_p2 = scmp.lt.s32.totalorder %s80_s18, %s80_s18 }
   0xa   :  { %v11_v3 = vld [vmem:[#allocation2] sm:$0x3]   ;;  %20 = vrot.lane.b32.xlu0 %v19_v2, %s104_s0  ;;  %32 = vrot.lane.b32.xlu1 %v19_v2, %s105_s10  ;;  %v15_v4 = vld [vmem:[#allocation2 + $0x8] sm:$0x3]  }
   0xb   :  { %13 = vst.msk [vmem:[#allocation0] ss:$16 sm:$0x3] %vm12_vm0, %v11_v3   ;;  %18 = vst.msk [vmem:[#allocation0 + $0x8] ss:$16 sm:$0x3] %vm12_vm0, %v15_v4   ;;  %p87_p3 = por %p86_p2, %p85_p1 }
   0xd   :  { %p88_p4 = pnand %p87_p3, %p81_p0 }
   0xe   :  { %26 = vrot.lane.b32.xlu0 %v19_v2, %s106_s11  ;;  %38 = vrot.lane.b32.xlu1 %v19_v2, %s107_s12 }
  0x12   :  { %44 = vrot.lane.b32.xlu0 %v19_v2, %s108_s13  ;;  %50 = vrot.lane.b32.xlu1 %v19_v2, %s109_s14 }
  0x16   :  { %56 = vrot.lane.b32.xlu0 %v19_v2, %s110_s15 }
  0x7c   :  { %v21_v5 = vpop.permute.xlu0 %20   ;;  %v33_v6 = vpop.permute.xlu1 %32  }
  0x7d   :  { %24 = vst.msk [vmem:[#allocation0 + $0x1] ss:$8 sm:$0xf] %vm12_vm0, %v21_v5   ;;  %36 = vst.msk [vmem:[#allocation0 + $0x3] ss:$8 sm:$0xf] %vm12_vm0, %v33_v6  }
  0x80   :  { %v27_v7 = vpop.permute.xlu0 %26   ;;  %v39_v8 = vpop.permute.xlu1 %38  }
  0x81   :  { %30 = vst.msk [vmem:[#allocation0 + $0x2] ss:$8 sm:$0xf] %vm12_vm0, %v27_v7   ;;  %42 = vst.msk [vmem:[#allocation0 + $0x4] ss:$8 sm:$0xf] %vm12_vm0, %v39_v8  }
  0x84   :  { %v45_v9 = vpop.permute.xlu0 %44   ;;  %v51_v10 = vpop.permute.xlu1 %50  }
  0x85   :  { %48 = vst.msk [vmem:[#allocation0 + $0x5] ss:$8 sm:$0xf] %vm12_vm0, %v45_v9   ;;  %54 = vst.msk [vmem:[#allocation0 + $0x6] ss:$8 sm:$0xf] %vm12_vm0, %v51_v10  }
  0x88   :  { %v57_v11 = vpop.permute.xlu0 %56  }
  0x89   :  { %60 = vst.msk [vmem:[#allocation0 + $0x7] ss:$8 sm:$0xf] %vm12_vm0, %v57_v11  }
  0x8a   :  { %91 = shalt.err (!%p88_p4)
}
  0x8b   :  { %s92_s21 = scalar_lea.hbm %s150_s1, 512 }
  0x8c   :  { %p93_p5 = scmp.ne.s32.totalorder %s150_s1, %s92_s21  ;;  %p96_p6 = scmp.lt.u32.totalorder %s92_s21, %s150_s1 }
  0x8e   :  { %p98_p7 = pnand %p96_p6, %p93_p5 }
  0x90   :  { %101 = shalt.err (!%p98_p7)
}
  0x91   :  { %68 = dma.vmem_to_hbm [thread:$0]  %s66_s17, 512, %s150_s1, [#allocation1]  }
  0x92   :  { %102 = dma.done.wait [#allocation1], 512  }
  0x93   :  { %103 = vsyncadd [#allocation1], 4294966784 }
  0x94   :  { %70 = vsyncpa [#allocation1], 1 }

// kernel: one_model_forward.3
= control target key start
LH: loop header
LB: loop body
LE: loop exit
PB: predicated region body
PF: predicated region fallthrough
CT: control target
= control target key end

     0   :  { %7 = vsyncpa [#allocation5], 0  ;;  %s286_s0 = inlined_call_operand.hbm [shape: f32[2,256], index: 0, kind: input, shape index: {}]   ;;  %s287_s1 = inlined_call_operand.hbm [shape: f32[2,256], index: 1, kind: input, shape index: {}]   ;;  %s288_s2 = inlined_call_operand.hbm [shape: f32[2,1], index: 2, kind: output, shape index: {}]  }
   0x1   :  { %8 = vsyncpa [#allocation8], 0 }
   0x2   :  { %9 = vsyncpa [#allocation6], 0  ;;  %s225_s9 = smov [#allocation4]   ;;  %s226_s11 = smov [#allocation7]  }
   0x3   :  { %s16_s10 = sshll.u32 %s225_s9, 4  ;;  %s26_s12 = sshll.u32 %s226_s11, 4  ;;  %s17_s10 = int_to_ptr.vmem [resolvable:$true] %s16_s10  ;;  %s27_s12 = int_to_ptr.vmem [resolvable:$true] %s26_s12 }
   0x4   :  { %s153_s15 = scalar_lea.hbm %s286_s0, 64 }
   0x5   :  { %p154_p0 = scmp.ne.s32.totalorder %s286_s0, %s153_s15  ;;  %p157_p1 = scmp.lt.u32.totalorder %s153_s15, %s286_s0 }
   0x7   :  { %p159_p2 = pnand %p157_p1, %p154_p0 }
   0x9   :  { %162 = shalt.err (!%p159_p2)
}
   0xa   :  { %s163_s20 = scalar_lea.vmem %s17_s10, 64  ;;  %p168_p4 = scmp.lt.s32.totalorder %s17_s10, %s17_s10 }
   0xb   :  { %p164_p3 = scmp.ne.s32.totalorder %s17_s10, %s163_s20  ;;  %p169_p5 = scmp.lt.s32.totalorder %s163_s20, %s163_s20 }
   0xd   :  { %p170_p6 = por %p169_p5, %p168_p4 }
   0xf   :  { %p171_p7 = pnand %p170_p6, %p164_p3 }
  0x11   :  { %174 = shalt.err (!%p171_p7)
}
  0x12   :  { %19 = dma.hbm_to_vmem [thread:$0]  %s286_s0, 64, %s17_s10, [#allocation5]  }
  0x13   :  { %s175_s25 = scalar_lea.hbm %s287_s1, 64 }
  0x14   :  { %p176_p8 = scmp.ne.s32.totalorder %s287_s1, %s175_s25  ;;  %p179_p9 = scmp.lt.u32.totalorder %s175_s25, %s287_s1 }
  0x16   :  { %p181_p10 = pnand %p179_p9, %p176_p8 }
  0x18   :  { %184 = shalt.err (!%p181_p10)
}
  0x19   :  { %s185_s30 = scalar_lea.vmem %s27_s12, 64  ;;  %p190_p12 = scmp.lt.s32.totalorder %s27_s12, %s27_s12 }
  0x1a   :  { %p186_p11 = scmp.ne.s32.totalorder %s27_s12, %s185_s30  ;;  %p191_p13 = scmp.lt.s32.totalorder %s185_s30, %s185_s30 }
  0x1c   :  { %p192_p0 = por %p191_p13, %p190_p12 }
  0x1e   :  { %p193_p1 = pnand %p192_p0, %p186_p11 }
  0x20   :  { %196 = shalt.err (!%p193_p1)
}
  0x21   :  { %29 = dma.hbm_to_vmem [thread:$0]  %s287_s1, 64, %s27_s12, [#allocation8]  }
  0x22   :  { %219 = dma.done.wait [#allocation5], 64  }
  0x23   :  { %220 = vsyncadd [#allocation5], 4294967232 }
  0x24   :  { %221 = dma.done.wait [#allocation8], 64  }
  0x25   :  { %222 = vsyncadd [#allocation8], 4294967232  ;;  %v43_v0 = vld [vmem:[#allocation4] sm:$0xf]  ;;  %v227_v4 = vmov 1983009808   ;;  %v60_v6 = vlaneseq }
  0x26   :  { %v140_v1 = vmul.f32 -1.442695, %v43_v0  ;;  %v58_v5 = vunpack.c.l.s4 %v227_v4  ;;  %v50_v7 = vld [vmem:[#allocation7] sm:$0xf]  ;;  %v228_v10 = vmov 0.0   ;;  %vm67_vm1 = vcmask 1041408  }
  0x27   :  { %v61_v9 = vshrl.u32 %v60_v6, 7  ;;  %vm51_vm0 = vcmp.eq.f32.partialorder %v50_v7, 1.0  ;;  %vm40_vm2 = vcmask 1024   ;;  %s229_s1 = smov [#allocation9]  }
  0x28   :  { %147 = vpow2.f32 %v140_v1  ;;  %v59_v8 = vunpack.c.0.s8 %v58_v5  ;;  %v141_v11 = vsel %vm51_vm0, 1.0, %v228_v10  ;;  %42 = vst.msk [vmem:[#allocation3] sm:$0x3] %vm40_vm2, %v228_v10  ;;  %41 = vst.msk [vmem:[#allocation2] sm:$0x3] %vm40_vm2, %v228_v10  ;;  %s130_s4 = sshll.u32 %s229_s1, 4  ;;  %s131_s4 = int_to_ptr.vmem [resolvable:$true] %s130_s4 }
  0x29   :  { %s197_s5 = scalar_lea.vmem %s131_s4, 32  ;;  %p202_p3 = scmp.lt.s32.totalorder %s131_s4, %s131_s4 }
  0x2a   :  { %v62_v12 = vsub.s32 %v59_v8, %v61_v9  ;;  %p198_p2 = scmp.ne.s32.totalorder %s131_s4, %s197_s5  ;;  %p203_p4 = scmp.lt.s32.totalorder %s197_s5, %s197_s5 }
  0x2c   :  { %v80_v13 = vrot.slane %v141_v11, %v62_v12  ;;  %p204_p5 = por %p203_p4, %p202_p3 }
  0x2e   :  { %v81_v18 = vcombine.high %v80_v13, %v80_v13  ;;  %v84_v25 = vsel %vm67_vm1, %v80_v13, 0.0  ;;  %p205_p6 = pnand %p204_p5, %p198_p2 }
  0x2f   :  { %v93_v31 = vld [vmem:[#allocation2] sm:$0x3]  ;;  %v54_v36 = vld [vmem:[#allocation3] sm:$0x3] }
  0x30   :  { %v85_v26 = vsel %vm67_vm1, %v81_v18, 0.0 }
  0x31   :  { %v86_v30 = vadd.f32 %v85_v26, %v84_v25 }
  0x32   :  { %v148_v2 = vpop.eup %147 }
  0x33   :  { %v47_v3 = vadd.f32 1.0, %v148_v2 }
  0x35   :  { %149 = vrcp.f32 %v47_v3 }
  0x3f   :  { %v150_v14 = vpop.eup %149 }
  0x40   :  { %v55_v15 = vmul.f32 %v150_v14, %v150_v14  ;;  %v94_v16 = vmul.f32 %v150_v14, %v141_v11 }
  0x42   :  { %v63_v17 = vrot.slane %v55_v15, %v62_v12  ;;  %v102_v19 = vrot.slane %v94_v16, %v62_v12 }
  0x44   :  { %v64_v20 = vcombine.high %v63_v17, %v63_v17  ;;  %v68_v21 = vsel %vm67_vm1, %v63_v17, 0.0  ;;  %v103_v22 = vcombine.high %v102_v19, %v102_v19  ;;  %v106_v23 = vsel %vm67_vm1, %v102_v19, 0.0 }
  0x46   :  { %v69_v24 = vsel %vm67_vm1, %v64_v20, 0.0  ;;  %v107_v27 = vsel %vm67_vm1, %v103_v22, 0.0 }
  0x47   :  { %v70_v28 = vadd.f32 %v69_v24, %v68_v21  ;;  %v108_v29 = vadd.f32 %v107_v27, %v106_v23 }
  0x49   :  { %71 = vadd.xlane.f32.xlu0 %v70_v28  ;;  %109 = vadd.xlane.f32.xlu1 %v108_v29 }
  0x4d   :  { %87 = vadd.xlane.f32.xlu0 %v86_v30 }
  0xd6   :  { %v72_v32 = vpop.xlane.xlu0 %71  ;;  %v110_v33 = vpop.xlane.xlu1 %109 }
  0xd7   :  { %v111_v34 = vadd.f32 %v110_v33, %v93_v31 }
  0xd9   :  { %112 = vst.msk [vmem:[#allocation2] sm:$0x3] %vm40_vm2, %v111_v34 }
  0xda   :  { %v88_v35 = vpop.xlane.xlu0 %87 }
  0xdb   :  { %v89_v37 = vadd.f32 %v88_v35, %v72_v32 }
  0xdd   :  { %v90_v38 = vadd.f32 %v89_v37, %v54_v36 }
  0xdf   :  { %92 = vst.msk [vmem:[#allocation3] sm:$0x3] %vm40_vm2, %v90_v38 }
  0xe0   :  { %v116_v41 = vld [vmem:[#allocation2] sm:$0x3] }
  0xe1   :  { %v117_v42 = vmul.f32 2.0, %v116_v41 }
  0xe6   :  { %v118_v39 = vld [vmem:[#allocation3] sm:$0x3] }
  0xe7   :  { %v119_v40 = vmax.f32 %v118_v39, 1e-08 }
  0xe9   :  { %151 = vrcp.f32 %v119_v40 }
  0xf3   :  { %v152_v43 = vpop.eup %151 }
  0xf4   :  { %v121_v44 = vmul.f32 %v152_v43, %v117_v42 }
  0xf6   :  { %v122_v45 = vsub.f32 1.0, %v121_v44 }
  0xf8   :  { %123 = vst.msk [vmem:[#allocation9] sm:$0x3] %vm40_vm2, %v122_v45 }
  0xf9   :  { %208 = shalt.err (!%p205_p6)
}
  0xfa   :  { %s209_s8 = scalar_lea.hbm %s288_s2, 32 }
  0xfb   :  { %p210_p7 = scmp.ne.s32.totalorder %s288_s2, %s209_s8  ;;  %p213_p8 = scmp.lt.u32.totalorder %s209_s8, %s288_s2 }
  0xfd   :  { %p215_p9 = pnand %p213_p8, %p210_p7 }
  0xff   :  { %218 = shalt.err (!%p215_p9)
}
 0x100   :  { %133 = dma.vmem_to_hbm [thread:$0]  %s131_s4, 32, %s288_s2, [#allocation6]  }
 0x101   :  { %223 = dma.done.wait [#allocation6], 32  }
 0x102   :  { %224 = vsyncadd [#allocation6], 4294967264 }
 0x103   :  { %137 = vsyncpa [#allocation5], 1 }
 0x104   :  { %138 = vsyncpa [#allocation8], 1 }
 0x105   :  { %139 = vsyncpa [#allocation6], 1 }

// kernel: one_model_forward.2
= control target key start
LH: loop header
LB: loop body
LE: loop exit
PB: predicated region body
PF: predicated region fallthrough
CT: control target
= control target key end

     0   :  { %s1667_s0 = inlined_call_operand.hbm [shape: f32[2,32,128], index: 0, kind: input, shape index: {}]   ;;  %s1668_s1 = inlined_call_operand.hbm [shape: f32[2,32,128], index: 1, kind: input, shape index: {}]   ;;  %s1669_s2 = inlined_call_operand.hbm [shape: f32[2,1,128], index: 2, kind: input, shape index: {}]   ;;  %s1670_s3 = inlined_call_operand.hbm [shape: f32[128,256], index: 3, kind: input, shape index: {}]   ;;  %s1671_s4 = inlined_call_operand.hbm [shape: f32[2,2,256], index: 4, kind: output, shape index: {}]  }
   0x1   :  { %1686 = sst [smem:[#allocation18_spill]] %s1668_s1 }
   0x2   :  { %9 = vsyncpa [#allocation3], 0 }
   0x3   :  { %11 = vsyncpa [#allocation3 + $0x1], 0 }
   0x4   :  { %12 = vsyncpa [#allocation6], 0 }
   0x5   :  { %14 = vsyncpa [#allocation6 + $0x1], 0 }
   0x6   :  { %15 = vsyncpa [#allocation9], 0 }
   0x7   :  { %16 = vsyncpa [#allocation4], 0 }
   0x8   :  { %18 = vsyncpa [#allocation4 + $0x1], 0  ;;  %s1347_s15 = smov 0   ;;  %s1349_s16 = smov 0  }
   0x9   :  { %s1351_s17 = smov 0   ;;  %s1353_s18 = smov 0  }
   0xa LB: > { %1687 = sst [smem:[#allocation15_spill]] %s1303_s17  ;;  %s1368_s19 = sadd.s32 1, %s1307_s18   ;;  %s1307_s18 = sphi %s1353_s18, %s1712_s18   ;;  %s1303_s17 = sphi %s1351_s17, %s1714_s17   ;;  %s1299_s16 = sphi %s1349_s16, %s1716_s16   ;;  %s1295_s15 = sphi %s1347_s15, %s1715_s15  }
   0xb   : > { %1688 = sst [smem:[#allocation16_spill]] %s1368_s19  ;;  %s31_s20 = sadd.s32 1, %s1303_s17 }
   0xc   : > { %s28_s21 = ssub.s32 %s1307_s18, %s1368_s19  ;;  %p1672_p0 = scmp.ne.s32.totalorder %s1303_s17, %s1299_s16 }
   0xd   : > { %p29_p1 = scmp.eq.s32.totalorder %s28_s21, 0  ;;  %p39_p2 = scmp.eq.s32.totalorder %s1307_s18, 0 }
   0xe   : > { %p1059_p4 = scmp.lt.s32.totalorder %s1307_s18, 2  ;;  %s1385_s23 = sand.u32 1, %s1303_s17  }
   0xf   : > { %s1379_s22 = scalar_select %p29_p1, %s1303_s17, %s31_s20  }
  0x10   : > { %p40_p5 = por %p39_p2, %p1672_p0  ;;  %s904_s24 = sshll.u32 %s1385_s23, 5 }
  0x11   : > { %1689 = sst [smem:[#allocation17_spill]] %s1379_s22  ;;  %s925_s25 = sshll.u32 %s1307_s18, 9 }
  0x12   : > { %p1389_p6 = pnand %p1059_p4, %p40_p5  ;;  %s201_s27 = sand.u32 1, %s1307_s18  }
  0x13   : > { %s1691_s1 = sld [smem:[#allocation18_spill]]  ;;  %s205_s5 = scalar_lea.vmem [#allocation5], %s904_s24 }
  0x14   : > { %s1690_s26 = scalar_select %p1389_p6, 1, 0 }
  0x15   : > { %s212_s6 = sshll.u32 %s205_s5, 4  ;;  %s1405_s7 = scalar_lea.sflag [#allocation6], %s201_s27  ;;  %s1403_s6 = int_to_ptr.vmem [resolvable:$true] %s212_s6 }
  0x16   : > { %p1411_p8 = pneg %p1389_p6 }
  0x18   : > { %s1692_s9 = scalar_select %p1411_p8, 1, 0 }
  0x19   : > { %s1399_s30 = scalar_lea.hbm %s1691_s1, %s925_s25  ;;  %s1120_s12 = scalar_lea.hbm %s1691_s1, 1024 }
  0x1a   : > { %s1115_s8 = scalar_lea.hbm %s1399_s30, 512  ;;  %p1121_p11 = scmp.lt.u32.totalorder %s1399_s30, %s1691_s1 }
  0x1b   : > { %p1116_p7 = scmp.ne.s32.totalorder %s1399_s30, %s1115_s8  ;;  %p1122_p12 = scmp.lt.u32.totalorder %s1120_s12, %s1115_s8 }
  0x1c   : > { %p1124_p1 = scmp.lt.u32.totalorder %s1115_s8, %s1399_s30 }
  0x1d   : > { %p1118_p9 = pnand %p1411_p8, %p1116_p7  ;;  %p1123_p13 = por %p1122_p12, %p1121_p11 }
  0x1f   : > { %p1119_p10 = pneg %p1118_p9  ;;  %p1125_p2 = por %p1124_p1, %p1123_p13 }
  0x21   : > { %p1126_p4 = pnand %p1125_p2, %p1119_p10 }
  0x23   : > { %1129 = shalt.err (!%p1126_p4)
}
  0x24   : > { %s1130_s20 = scalar_lea.vmem %s1403_s6, 512  ;;  %s1309_s21 = smov [#allocation5]  }
  0x25   : > { %p1131_p5 = scmp.ne.s32.totalorder %s1403_s6, %s1130_s20  ;;  %s1135_s27 = sshll.u32 %s1309_s21, 4  ;;  %s1136_s27 = int_to_ptr.vmem [resolvable:$false] %s1135_s27 }
  0x26   : > { %s1137_s28 = scalar_lea.vmem %s1136_s27, 1024  ;;  %p1138_p3 = scmp.lt.s32.totalorder %s1403_s6, %s1136_s27 }
  0x27   : > { %p1133_p7 = pnand %p1131_p5, %p1411_p8  ;;  %p1139_p0 = scmp.lt.s32.totalorder %s1137_s28, %s1130_s20 }
  0x29   : > { %p1134_p9 = pneg %p1133_p7  ;;  %p1140_p11 = por %p1139_p0, %p1138_p3 }
  0x2b   : > { %p1141_p12 = pnand %p1140_p11, %p1134_p9 }
  0x2d   : > { %1144 = shalt.err (!%p1141_p12)
}
  0x2e   : > { %s1673_s29 = smov 128   ;;  %s1674_s5 = smov 8  }
  0x2f   : > { %1050 = dma.hbm_to_vmem [thread:$0]  (!%p1389_p6), %s1399_s30, 512, %s1403_s6, %s1405_s7, %s1673_s29, %s1673_s29, %s1674_s5  }
  0x30   : > { %s1439_s8 = sadd.s32 4294967295, %s1307_s18   ;;  %s900_s10 = sadd.s32 4294967294, %s1307_s18  }
  0x31   : > { %p44_p0 = scmp.ne.s32.totalorder %s1299_s16, %s1295_s15  ;;  %p1676_p3 = scmp.eq.s32.totalorder %s1439_s8, 0 }
  0x32   : > { %p141_p10 = scmp.eq.s32.totalorder %s1439_s8, 1  ;;  %p147_p13 = scmp.eq.s32.totalorder %s900_s10, 1 }
  0x33   : > { %p1448_p1 = por %p1676_p3, %p44_p0  ;;  %p901_p2 = scmp.ge.s32.totalorder %s1307_s18, 1 }
  0x34   : > { %p1694_p4 = scmp.ne.s32.totalorder %s1303_s17, %s1299_s16  ;;  %p1460_p7 = por %p147_p13, %p44_p0 }
  0x35   : > { %s1693_s11 = scalar_select %p1448_p1, 1, 0 }
  0x36   : > { %p1456_p5 = por %p141_p10, %p1694_p4  ;;  %p154_p9 = scmp.lt.s32.totalorder %s1307_s18, 3 }
  0x37   : > { %s1696_s6 = scalar_select %p1460_p7, 1, 0 }
  0x38   : > { %s1695_s30 = scalar_select %p1456_p5, 1, 0 }
  0x39   : > { %p1465_p11 = pnand %p901_p2, %p154_p9  ;;  %s1312_s13 = smov [#allocation8]  }
  0x3a   : > { %s166_s14 = sshll.u32 %s1312_s13, 4  ;;  %s1478_s27 = scalar_lea.hbm %s1667_s0, %s925_s25  ;;  %s1469_s14 = int_to_ptr.vmem [resolvable:$true] %s166_s14 }
  0x3b   : > { %s1697_s12 = scalar_select %p1465_p11, 1, 0 }
  0x3c   : > { %p1040_p12 = pneg %p1465_p11  ;;  %s184_s10 = scalar_lea.vmem [#allocation2], %s904_s24 }
  0x3d   : > { %s191_s29 = sshll.u32 %s184_s10, 4  ;;  %s1145_s22 = scalar_lea.hbm %s1670_s3, 4096  ;;  %s1488_s29 = int_to_ptr.vmem [resolvable:$true] %s191_s29 }
  0x3e   : > { %p1482_p0 = pnand %p1040_p12, %p1676_p3  ;;  %p1146_p10 = scmp.ne.s32.totalorder %s1670_s3, %s1145_s22 }
  0x3f   : > { %p1152_p9 = scmp.lt.u32.totalorder %s1145_s22, %s1670_s3 }
  0x40   : > { %p1147_p13 = pneg %p1482_p0 }
  0x42   : > { %p1148_p2 = pnand %p1147_p13, %p1146_p10 }
  0x44   : > { %p1149_p4 = pneg %p1148_p2 }
  0x46   : > { %p1154_p12 = pnand %p1152_p9, %p1149_p4 }
  0x48   : > { %1157 = shalt.err (!%p1154_p12)
}
  0x49   : > { %s1158_s24 = scalar_lea.vmem %s1469_s14, 4096  ;;  %p1166_p1 = scmp.lt.s32.totalorder %s1469_s14, %s1469_s14 }
  0x4a   : > { %p1159_p3 = scmp.ne.s32.totalorder %s1469_s14, %s1158_s24  ;;  %p1167_p11 = scmp.lt.s32.totalorder %s1158_s24, %s1158_s24 }
  0x4c   : > { %p1161_p7 = pnand %p1159_p3, %p1147_p13  ;;  %p1168_p6 = por %p1167_p11, %p1166_p1 }
  0x4e   : > { %p1162_p5 = pneg %p1161_p7 }
  0x50   : > { %p1169_p8 = pnand %p1168_p6, %p1162_p5 }
  0x52   : > { %1172 = shalt.err (!%p1169_p8)
}
  0x53   : > { %s1313_s1 = smov 256   ;;  %s1314_s17 = smov 16  }
  0x54   : > { %1043 = dma.hbm_to_vmem [thread:$0]  (!%p1482_p0), %s1670_s3, 4096, %s1469_s14, [#allocation9], %s1313_s1, %s1313_s1, %s1314_s17  }
  0x55   : > { %s181_s10 = scalar_lea.sflag [#allocation3], %s1385_s23  ;;  %s1173_s20 = scalar_lea.hbm %s1478_s27, 512 }
  0x56   : > { %p1174_p3 = scmp.ne.s32.totalorder %s1478_s27, %s1173_s20  ;;  %p1699_p6 = scmp.ne.s32.totalorder %s1692_s9, 0 }
  0x57   : > { %s1178_s24 = scalar_lea.hbm %s1667_s0, 1024  ;;  %p1179_p5 = scmp.lt.u32.totalorder %s1478_s27, %s1667_s0 }
  0x58   : > { %p1176_p8 = pnand %p1174_p3, %p1699_p6  ;;  %p1180_p7 = scmp.lt.u32.totalorder %s1178_s24, %s1173_s20 }
  0x59   : > { %p1182_p10 = scmp.lt.u32.totalorder %s1173_s20, %s1478_s27 }
  0x5a   : > { %p1177_p1 = pneg %p1176_p8  ;;  %p1181_p11 = por %p1180_p7, %p1179_p5 }
  0x5c   : > { %p1183_p13 = por %p1182_p10, %p1181_p11 }
  0x5e   : > { %p1184_p2 = pnand %p1183_p13, %p1177_p1 }
  0x60   : > { %1187 = shalt.err (!%p1184_p2)
}
  0x61   : > { %s1188_s14 = scalar_lea.vmem %s1488_s29, 512  ;;  %s1315_s28 = smov [#allocation2]  }
  0x62   : > { %p1189_p0 = scmp.ne.s32.totalorder %s1488_s29, %s1188_s14  ;;  %s1193_s1 = sshll.u32 %s1315_s28, 4  ;;  %s1194_s1 = int_to_ptr.vmem [resolvable:$false] %s1193_s1 }
  0x63   : > { %s1195_s19 = scalar_lea.vmem %s1194_s1, 1024  ;;  %p1196_p12 = scmp.lt.s32.totalorder %s1488_s29, %s1194_s1 }
  0x64   : > { %p1191_p4 = pnand %p1189_p0, %p1699_p6  ;;  %p1197_p3 = scmp.lt.s32.totalorder %s1195_s19, %s1188_s14 }
  0x66   : > { %p1192_p9 = pneg %p1191_p4  ;;  %p1198_p8 = por %p1197_p3, %p1196_p12 }
  0x68   : > { %p1199_p5 = pnand %p1198_p8, %p1192_p9 }
  0x6a   : > { %1202 = shalt.err (!%p1199_p5)
}
  0x6b   : > { %p1700_p1 = scmp.ne.s32.totalorder %s1690_s26, 0  ;;  %s1701_s13 = smov 8  }
  0x6c   : > { %s1702_s17 = smov 128   ;;  %s1703_s22 = sshll.u32 %s1307_s18, 4 }
  0x6d   : > { %1047 = dma.hbm_to_vmem [thread:$0]  (!%p1700_p1), %s1478_s27, 512, %s1488_s29, %s181_s10, %s1702_s17, %s1702_s17, %s1701_s13  }
  0x6e   : > { %s1544_s25 = scalar_lea.hbm %s1669_s2, %s1703_s22  ;;  %s225_s21 = scalar_lea.vmem [#allocation7], %s1385_s23 }
  0x6f   : > { %s232_s24 = sshll.u32 %s225_s21, 4  ;;  %s1203_s14 = scalar_lea.hbm %s1544_s25, 16  ;;  %s233_s24 = int_to_ptr.vmem [resolvable:$true] %s232_s24 }
  0x70   : > { %p1204_p7 = scmp.ne.s32.totalorder %s1544_s25, %s1203_s14  ;;  %s1208_s27 = scalar_lea.hbm %s1669_s2, 32 }
  0x71   : > { %p1209_p13 = scmp.lt.u32.totalorder %s1544_s25, %s1669_s2  ;;  %p1210_p2 = scmp.lt.u32.totalorder %s1208_s27, %s1203_s14 }
  0x72   : > { %p1206_p11 = pnand %p1204_p7, %p1699_p6  ;;  %p1212_p4 = scmp.lt.u32.totalorder %s1203_s14, %s1544_s25 }
  0x73   : > { %p1211_p0 = por %p1210_p2, %p1209_p13 }
  0x74   : > { %p1207_p10 = pneg %p1206_p11 }
  0x75   : > { %p1213_p9 = por %p1212_p4, %p1211_p0 }
  0x77   : > { %p1214_p12 = pnand %p1213_p9, %p1207_p10 }
  0x79   : > { %1217 = shalt.err (!%p1214_p12)
}
  0x7a   : > { %s1218_s23 = scalar_lea.vmem %s233_s24, 16  ;;  %s1316_s19 = smov [#allocation7]  }
  0x7b   : > { %p1219_p3 = scmp.ne.s32.totalorder %s233_s24, %s1218_s23  ;;  %s1223_s13 = sshll.u32 %s1316_s19, 4  ;;  %s1224_s13 = int_to_ptr.vmem [resolvable:$false] %s1223_s13 }
  0x7c   : > { %s1225_s17 = scalar_lea.vmem %s1224_s13, 32  ;;  %p1226_p7 = scmp.lt.s32.totalorder %s233_s24, %s1224_s13 }
  0x7d   : > { %p1221_p8 = pnand %p1219_p3, %p1699_p6  ;;  %p1227_p11 = scmp.lt.s32.totalorder %s1225_s17, %s1218_s23 }
  0x7f   : > { %p1222_p5 = pneg %p1221_p8  ;;  %p1228_p1 = por %p1227_p11, %p1226_p7 }
  0x81   : > { %p1229_p2 = pnand %p1228_p1, %p1222_p5 }
  0x83   : > { %1232 = shalt.err (!%p1229_p2)
}
  0x84   : > { %p1704_p13 = scmp.ne.s32.totalorder %s1690_s26, 0  ;;  %p1705_p10 = scmp.ne.s32.totalorder %s1697_s12, 0 }
  0x85   : > { %s1568_s9 = sand.u32 (!%p1705_p10), 1, %s1299_s16   ;;  %p1706_p6 = scmp.ne.s32.totalorder (!%p1705_p10), %s1693_s11, 0 }
  0x86   : > { %1053 = dma.hbm_to_vmem [thread:$0]  (!%p1704_p13), %s1544_s25, 16, %s233_s24, %s1405_s7  }
  0x87   : > { %241 = sbr.rel (%p1705_p10) target bundleno = 1161 (0x489), region = 36  ;;  %s912_s22 = sshll.u32 (!%p1705_p10), %s1568_s9, 5 }
  0x88   : > { %s244_s5 = scalar_lea.sflag (!%p1705_p10), [#allocation3], %s1568_s9  ;;  %s1572_s20 = scalar_lea.vmem (!%p1705_p10), [#allocation2], %s912_s22 }
  0x8e   : > { %1278 = dma.done.wait (%p1706_p6), %s244_s5, 512  }
  0x8f   : > { %1280 = vsyncadd (%p1706_p6), %s244_s5, 4294966784  ;;  %s252_s26 = sand.u32 1, %s1439_s8   ;;  %s256_s12 = scalar_lea.vmem [#allocation5], %s912_s22 }
  0x90   : > { %s253_s7 = scalar_lea.sflag [#allocation6], %s252_s26 }
  0x91   : > { %1282 = dma.done.wait (%p1706_p6), %s253_s7, 528  }
  0x92   : > { %1284 = vsyncadd (%p1706_p6), %s253_s7, 4294966768  ;;  %s264_s25 = scalar_lea.vmem [#allocation7], %s1568_s9  ;;  %p1707_p1 = scmp.eq.s32.totalorder %s1439_s8, 0 }
  0x94   : > { %1286 = dma.done.wait (%p1707_p1), [#allocation9], 4096   ;;  %p1708_p0 = pmov %p1707_p1 }
  0x95   : > { %v311_v0 = vlaneseq  ;;  %v1317_v1 = vmov 0.0|0.0   ;;  %vm1318_vm0 = vmmov 0   ;;  %v1319_v3 = vmov 0.0   ;;  %v310_v4 = vld [vmem:[%s264_s25] sm:$0x1]  ;;  %v307_v6 = vld [vmem:[%s256_s12 + $0x8] sm:$0xff] }
  0x96   : > { %1288 = vsyncadd (%p1708_p0), [#allocation9], 4294963200  ;;  %976 = vmatprep.subr.bf16.mxu1 %v1317_v1  ;;  %951 = vmatprep.mubr.msk.f32.mxu1 %vm1318_vm0, %v1319_v3  ;;  %vm320_vm2 = vcmask 1040384   ;;  %v306_v5 = vld [vmem:[%s256_s12] sm:$0xff]  ;;  %v315_v10 = vsub.f32 1.0, %v310_v4  ;;  %v308_v11 = vld [vmem:[%s256_s12 + $0x10] sm:$0xff] }
  0x97   : > { %v1588_v2 = vand.u32 127, %v311_v0  ;;  %704 = vmatprep.mubr.f32.mxu0 %v1319_v3  ;;  %v977_v8 = vpack.c.bf16 %v307_v6, %v306_v5  ;;  %v309_v12 = vld [vmem:[%s256_s12 + $0x18] sm:$0xff]  ;;  %v302_v17 = vld [vmem:[%s1572_s20] sm:$0xff]  ;;  %v303_v18 = vld [vmem:[%s1572_s20 + $0x8] sm:$0xff]  ;;  %vm429_vm3 = vcmask 261120   ;;  %v1320_v27 = vmov 1.0  }
  0x98   : > { %v980_v13 = vpack.c.bf16 %v309_v12, %v308_v11  ;;  %v425_v19 = vmul.f32 %v302_v17, %v302_v17  ;;  %v426_v20 = vmul.f32 %v303_v18, %v303_v18  ;;  %v304_v22 = vld [vmem:[%s1572_s20 + $0x10] sm:$0xff]  ;;  %v305_v23 = vld [vmem:[%s1572_s20 + $0x18] sm:$0xff]  ;;  %v989_v28 = vpack.c.bf16 %v303_v18, %v302_v17  ;;  %v608_v58 = vld [vmem:[#allocation8] sm:$0xff]  ;;  %s915_s28 = sshll.u32 %s1568_s9, 2  ;;  %s927_s29 = sshll.u32 %s1439_s8, 6 }
  0x99   : > { %vm313_vm1 = vcmp.lt.s32.totalorder %v1588_v2, 64  ;;  %978 = vmatpush3.bf16.xpose.msra.mxu1 %v977_v8  ;;  %v427_v24 = vmul.f32 %v304_v22, %v304_v22  ;;  %v428_v25 = vmul.f32 %v305_v23, %v305_v23  ;;  %v992_v29 = vpack.c.bf16 %v305_v23, %v304_v22  ;;  %v609_v56 = vld [vmem:[#allocation8 + $0x8] sm:$0xff]  ;;  %v611_v57 = vld [vmem:[#allocation8 + $0x18] sm:$0xff]  ;;  %v610_v60 = vld [vmem:[#allocation8 + $0x10] sm:$0xff]  ;;  %s301_s27 = scalar_lea.vmem [#allocation10], %s915_s28  ;;  %s1623_s19 = scalar_lea.hbm %s1671_s4, %s927_s29 }
  0x9a   : > { %v314_v7 = vsel %vm313_vm1, %v310_v4, 0.0  ;;  %979 = vmatprep.subr.bf16.mxu1 %v1317_v1  ;;  %v316_v14 = vsel %vm313_vm1, %v315_v10, 0.0  ;;  %v983_v21 = vpack.c.bf16 %v426_v20, %v425_v19  ;;  %v336_v37 = vshrl.u32 %v311_v0, 7  ;;  %v613_v61 = vld [vmem:[#allocation8 + $0x28] sm:$0xff]  ;;  %v615_v62 = vld [vmem:[#allocation8 + $0x38] sm:$0xff]  ;;  %v616_v8 = vld [vmem:[#allocation8 + $0x40] sm:$0xff] }
  0x9b   : > { %v322_v9 = vsel %vm320_vm2, %v314_v7, 0.0  ;;  %v318_v15 = vrot.slane %v316_v14, 7  ;;  %v986_v26 = vpack.c.bf16 %v428_v25, %v427_v24  ;;  %vm414_vm5 = vcmask 254976   ;;  %v617_v4 = vld [vmem:[#allocation8 + $0x48] sm:$0xff]  ;;  %v619_v5 = vld [vmem:[#allocation8 + $0x58] sm:$0xff]  ;;  %s780_s10 = sshll.u32 %s301_s27, 4  ;;  %s1625_s10 = int_to_ptr.vmem [resolvable:$true] %s780_s10 }
  0x9c   : > { %323 = vadd.xlane.f32.xlu0 %v322_v9  ;;  %vm337_vm4 = vcmp.eq.s32.totalorder %v336_v37, 0  ;;  %v585_v52 = vsub.s32 0, %v336_v37  ;;  %v994_v59 = vpack.c.bf16 %v611_v57, %v609_v56  ;;  %v996_v63 = vpack.c.bf16 %v610_v60, %v608_v58  ;;  %v618_v9 = vld [vmem:[#allocation8 + $0x50] sm:$0xff]  ;;  %s766_s13 = scalar_lea.sflag [#allocation4], %s1568_s9  ;;  %s1233_s8 = scalar_lea.vmem %s1625_s10, 64 }
  0x9d   : > { %v321_v16 = vsel %vm320_vm2, %v314_v7, %v318_v15  ;;  %v998_v0 = vpack.c.bf16 %v615_v62, %v613_v61  ;;  %v1002_v7 = vpack.c.bf16 %v619_v5, %v617_v4  ;;  %v1004_v10 = vpack.c.bf16 %v618_v9, %v616_v8  ;;  %v626_v37 = vld [vmem:[#allocation8 + $0x90] sm:$0xff]  ;;  %p1234_p4 = scmp.ne.s32.totalorder %s1625_s10, %s1233_s8  ;;  %p1709_p9 = scmp.ne.s32.totalorder %s1695_s30, 0 }
  0x9e   : > { %995 = vmatprep.subr.bf16.mxu0 %v994_v59  ;;  %vm594_vm10 = vcmask 1041408   ;;  %s1321_s17 = smov [#allocation10]  }
  0x9f   : > { %997 = vmatpush1.bf16.msra.mxu0 %v996_v63  ;;  %p1235_p12 = pnand %p1234_p4, %p1709_p9  ;;  %s1237_s22 = sshll.u32 %s1321_s17, 4  ;;  %s1238_s22 = int_to_ptr.vmem [resolvable:$false] %s1237_s22 }
  0xa0   : > { %999 = vmatprep.subr.bf16.mxu0 %v998_v0  ;;  %s1239_s5 = scalar_lea.vmem %s1238_s22, 128  ;;  %p1240_p8 = scmp.lt.s32.totalorder %s1625_s10, %s1238_s22 }
  0xa1   : > { %981 = vmatpush3.bf16.xpose.msra.mxu1 %v980_v13  ;;  %p1236_p3 = pneg %p1235_p12  ;;  %p1241_p5 = scmp.lt.s32.totalorder %s1239_s5, %s1233_s8 }
  0xa2   : > { %982 = vmatprep.subr.bf16.mxu1 %v1317_v1 }
  0xa3   : > { %p1242_p7 = por %p1241_p5, %p1240_p8 }
  0xa5   : > { %p1243_p11 = pnand %p1242_p7, %p1236_p3 }
  0xa8   : > { %952 = vmatmul.mubr.f32.vlgmr.msra.gmra.mrb[0].mxu1 %v321_v16 }
  0xa9   : > { %962 = vmatprep.mubr.msk.f32.mxu1 %vm1318_vm0, %v1319_v3  ;;  %984 = vmatpush3.bf16.msra.mxu1 %v983_v21 }
  0xaa   : > { %985 = vmatprep.subr.bf16.mxu1 %v1317_v1 }
  0xad   : > { %987 = vmatpush3.bf16.msra.mxu1 %v986_v26 }
  0xae   : > { %988 = vmatprep.subr.bf16.mxu1 %v1317_v1 }
  0xb0   : > { %963 = vmatmul.mubr.msk.f32.vlgmr.msra.gmra.mrb[2].mxu1 %vm429_vm3, %v1320_v27  ;;  %v621_v27 = vld [vmem:[#allocation8 + $0x68] sm:$0xff] }
  0xb1   : > { %973 = vmatprep.mubr.msk.f32.mxu1 %vm1318_vm0, %v1319_v3  ;;  %990 = vmatpush3.bf16.msra.mxu1 %v989_v28  ;;  %v614_v3 = vld [vmem:[#allocation8 + $0x30] sm:$0xff]  ;;  %v623_v28 = vld [vmem:[#allocation8 + $0x78] sm:$0xff] }
  0xb2   : > { %991 = vmatprep.subr.bf16.mxu1 %v1317_v1  ;;  %v612_v1 = vld [vmem:[#allocation8 + $0x20] sm:$0xff] }
  0xb3   : > { %v1000_v6 = vpack.c.bf16 %v614_v3, %v612_v1 }
  0xb5   : > { %993 = vmatpush3.bf16.msra.mxu1 %v992_v29  ;;  %1001 = vmatpush1.bf16.msra.mxu0 %v1000_v6  ;;  %v1006_v29 = vpack.c.bf16 %v623_v28, %v621_v27 }
  0xb6   : > { %1003 = vmatprep.subr.bf16.mxu0 %v1002_v7 }
  0xb9   : > { %1005 = vmatpush1.bf16.msra.mxu0 %v1004_v10 }
  0xba   : > { %1007 = vmatprep.subr.bf16.mxu0 %v1006_v29 }
 0x129   : > { %v324_v30 = vpop.xlane.xlu0 %323 }
 0x12a   : > { %v325_v31 = vrot.slane %v324_v30, 4 }
 0x12c   : > { %v326_v32 = vadd.f32 %v325_v31, %v324_v30  ;;  %v620_v30 = vld [vmem:[#allocation8 + $0x60] sm:$0xff]  ;;  %v622_v31 = vld [vmem:[#allocation8 + $0x70] sm:$0xff] }
 0x12e   : > { %v327_v33 = vrot.slane %v326_v32, 2 }
 0x130   : > { %v328_v34 = vadd.f32 %v327_v33, %v326_v32  ;;  %v1008_v32 = vpack.c.bf16 %v622_v31, %v620_v30  ;;  %v625_v33 = vld [vmem:[#allocation8 + $0x88] sm:$0xff] }
 0x132   : > { %v329_v35 = vrot.slane %v328_v34, 1  ;;  %1009 = vmatpush1.bf16.msra.mxu0 %v1008_v32 }
 0x134   : > { %v330_v36 = vadd.f32 %v329_v35, %v328_v34  ;;  %v627_v34 = vld [vmem:[#allocation8 + $0x98] sm:$0xff] }
 0x135   : > { %v1010_v35 = vpack.c.bf16 %v627_v34, %v625_v33 }
 0x136   : > { %1026 = vpush %v330_v36  ;;  %v624_v36 = vld [vmem:[#allocation8 + $0x80] sm:$0xff] }
 0x137   : > { %1011 = vmatprep.subr.bf16.mxu0 %v1010_v35 }
 0x167   : > { %s1027_s11 = spop %1026 }
 0x168   : > { %s333_s21 = ssub.f32 64.0, %s1027_s11 }
 0x169   : > { %s332_s14 = sadd.f32 0.0005, %s1027_s11 }
 0x16a   : > { %s334_s24 = sadd.f32 0.0005, %s333_s21 }
 0x16b   : > { %v338_v39 = vstv %s332_s14 }
 0x16c   : > { %v339_v38 = vstv %s334_s24 }
 0x16d   : > { %v340_v40 = vsel %vm337_vm4, %v338_v39, %v339_v38  ;;  %v1012_v38 = vpack.c.bf16 %v626_v37, %v624_v36  ;;  %v629_v39 = vld [vmem:[#allocation8 + $0xa8] sm:$0xff] }
 0x16e   : > { %1103 = vrcp.f32 %v340_v40  ;;  %v631_v40 = vld [vmem:[#allocation8 + $0xb8] sm:$0xff] }
 0x16f   : > { %1013 = vmatpush1.bf16.msra.mxu0 %v1012_v38 }
 0x178   : > { %v1104_v41 = vpop.eup %1103 }
 0x17b   : > { %v408_v42 = vpop.f32.mrb[0].mxu1 }
 0x17c   : > { %v412_v43 = vmul.f32 %v1104_v41, %v408_v42  ;;  %v953_v44 = vpop.f32.mrb[1].mxu1  ;;  %v1014_v41 = vpack.c.bf16 %v631_v40, %v629_v39  ;;  %v628_v42 = vld [vmem:[#allocation8 + $0xa0] sm:$0xff] }
 0x17d   : > { %v633_v44 = vld [vmem:[#allocation8 + $0xc8] sm:$0xff] }
 0x17e   : > { %974 = vmatmul.mubr.msk.f32.vlgmr.msra.gmra.mrb[4].mxu1 %vm429_vm3, %v412_v43  ;;  %v413_v45 = vmul.f32 %v412_v43, %v412_v43  ;;  %v630_v43 = vld [vmem:[#allocation8 + $0xb0] sm:$0xff]  ;;  %1015 = vmatprep.subr.bf16.mxu0 %v1014_v41 }
 0x180   : > { %v415_v46 = vsel %vm414_vm5, %v413_v45, 0.0  ;;  %v1016_v45 = vpack.c.bf16 %v630_v43, %v628_v42 }
 0x181   : > { %416 = vadd.xlane.f32.xlu0 %v415_v46  ;;  %v635_v46 = vld [vmem:[#allocation8 + $0xd8] sm:$0xff] }
 0x182   : > { %1017 = vmatpush1.bf16.msra.mxu0 %v1016_v45 }
 0x183   : > { %v499_v47 = vpop.f32.mrb[2].mxu1 }
 0x184   : > { %1105 = vrsqrt.f32 %v499_v47  ;;  %v964_v48 = vpop.f32.mrb[3].mxu1  ;;  %vm505_vm6 = vcmp.eq.f32.partialorder %v499_v47, inf  ;;  %v508_v50 = vand.u32 2147483648, %v499_v47  ;;  %vm507_vm7 = vcmp.eq.f32.partialorder %v499_v47, 0.0 }
 0x185   : > { %v634_v48 = vld [vmem:[#allocation8 + $0xd0] sm:$0xff] }
 0x18e   : > { %v1106_v49 = vpop.eup %1105 }
 0x18f   : > { %v504_v51 = vmul.f32 %v1106_v49, %v499_v47  ;;  %v1018_v49 = vpack.c.bf16 %v635_v46, %v633_v44 }
 0x191   : > { %v506_v53 = vsel %vm505_vm6, %v499_v47, %v504_v51  ;;  %v632_v47 = vld [vmem:[#allocation8 + $0xc0] sm:$0xff]  ;;  %v639_v51 = vld [vmem:[#allocation8 + $0xf8] sm:$0xff]  ;;  %1019 = vmatprep.subr.bf16.mxu0 %v1018_v49 }
 0x192   : > { %v509_v54 = vsel %vm507_vm7, %v508_v50, %v506_v53  ;;  %v637_v50 = vld [vmem:[#allocation8 + $0xe8] sm:$0xff] }
 0x193   : > { %v586_v55 = vrot.slane %v509_v54, %v585_v52  ;;  %v1020_v52 = vpack.c.bf16 %v634_v48, %v632_v47  ;;  %v1022_v53 = vpack.c.bf16 %v639_v51, %v637_v50  ;;  %v636_v54 = vld [vmem:[#allocation8 + $0xe0] sm:$0xff] }
 0x195   : > { %1021 = vmatpush1.bf16.msra.mxu0 %v1020_v52 }
 0x196   : > { %1023 = vmatprep.subr.bf16.mxu0 %v1022_v53 }
 0x20e   : > { %v417_v11 = vpop.xlane.xlu0 %416 }
 0x20f   : > { %1107 = vrsqrt.f32 %v417_v11  ;;  %vm420_vm8 = vcmp.eq.f32.partialorder %v417_v11, inf  ;;  %v423_v15 = vand.u32 2147483648, %v417_v11  ;;  %vm422_vm9 = vcmp.eq.f32.partialorder %v417_v11, 0.0 }
 0x219   : > { %v1108_v12 = vpop.eup %1107 }
 0x21a   : > { %v419_v13 = vmul.f32 %v1108_v12, %v417_v11 }
 0x21c   : > { %v421_v14 = vsel %vm420_vm8, %v417_v11, %v419_v13 }
 0x21d   : > { %v424_v16 = vsel %vm422_vm9, %v423_v15, %v421_v14 }
 0x21e   : > { %v587_v17 = vmul.f32 %v586_v55, %v424_v16  ;;  %v638_v55 = vld [vmem:[#allocation8 + $0xf0] sm:$0xff] }
 0x21f   : > { %v1024_v56 = vpack.c.bf16 %v638_v55, %v636_v54 }
 0x220   : > { %v588_v18 = vadd.f32 1e-07, %v587_v17 }
 0x221   : > { %1025 = vmatpush1.bf16.msra.mxu0 %v1024_v56 }
 0x222   : > { %1109 = vrcp.f32 %v588_v18 }
 0x22c   : > { %v1110_v19 = vpop.eup %1109 }
 0x251   : > { %v579_v20 = vpop.f32.mrb[4].mxu1 }
 0x252   : > { %v590_v21 = vmul.f32 %v1110_v19, %v579_v20  ;;  %v975_v22 = vpop.f32.mrb[5].mxu1 }
 0x254   : > { %v593_v23 = vsel %vm313_vm1, %v590_v21, inf  ;;  %v598_v25 = vsel %vm313_vm1, %v590_v21, -inf }
 0x255   : > { %v595_v24 = vsel %vm594_vm10, %v593_v23, inf  ;;  %v599_v26 = vsel %vm594_vm10, %v598_v25, -inf }
 0x256   : > { %596 = vmin.xlane.f32.xlu1 %v595_v24 }
 0x25a   : > { %600 = vmax.xlane.f32.xlu1 %v599_v26 }
 0x2e3   : > { %v597_v57 = vpop.xlane.xlu1 %596 }
 0x2e4   : > { %v602_v61 = vsub.f32 %v590_v21, %v597_v57 }
 0x2e7   : > { %v601_v58 = vpop.xlane.xlu1 %600 }
 0x2e8   : > { %v603_v59 = vsub.f32 %v601_v58, %v597_v57 }
 0x2ea   : > { %v604_v60 = vadd.f32 1e-07, %v603_v59 }
 0x2ec   : > { %1111 = vrcp.f32 %v604_v60 }
 0x2f6   : > { %v1112_v62 = vpop.eup %1111 }
 0x2f7   : > { %v606_v63 = vmul.f32 %v1112_v62, %v602_v61 }
 0x2f9   : > { %918 = vmatmul.mubr.msk.f32.vlgmr.msra.gmra.mrb[0].mxu0 %vm313_vm1, %v606_v63 }
 0x3cc   : > { %v706_v0 = vpop.f32.mrb[0].mxu0 }
 0x3cd   : > { %v713_v1 = vrot.slane %v706_v0, 1  ;;  %v708_v3 = vpop.f32.mrb[1].mxu0 }
 0x3ce   : > { %v714_v4 = vrot.slane %v708_v3, 1 }
 0x3cf   : > { %v717_v5 = vsub.f32 %v706_v0, %v713_v1 }
 0x3d0   : > { %v718_v6 = vsub.f32 %v708_v3, %v714_v4 }
 0x3d1   : > { %v719_v7 = vmax.f32 %v717_v5, 0.0 }
 0x3d2   : > { %v720_v8 = vmax.f32 %v718_v6, 0.0 }
 0x3d3   : > { %v733_v9 = vsel %vm320_vm2, %v719_v7, -inf  ;;  %v726_v10 = vsel %vm320_vm2, %v719_v7, inf }
 0x3d4   : > { %v734_v11 = vsel %vm320_vm2, %v720_v8, -inf  ;;  %v727_v12 = vsel %vm320_vm2, %v720_v8, inf }
 0x3d5   : > { %v735_v13 = vmax.f32 %v733_v9, %v734_v11  ;;  %v728_v2 = vmin.f32 %v726_v10, %v727_v12 }
 0x3d7   : > { %736 = vmax.xlane.f32.xlu1 %v735_v13  ;;  %729 = vmin.xlane.f32.xlu0 %v728_v2 }
 0x464   : > { %v737_v14 = vpop.xlane.xlu1 %736  ;;  %v730_v15 = vpop.xlane.xlu0 %729 }
 0x465   : > { %v740_v16 = vsub.f32 %v737_v14, %v730_v15  ;;  %v738_v18 = vsub.f32 %v719_v7, %v730_v15  ;;  %v739_v19 = vsub.f32 %v720_v8, %v730_v15 }
 0x467   : > { %v741_v17 = vadd.f32 1e-07, %v740_v16 }
 0x469   : > { %1113 = vrcp.f32 %v741_v17 }
 0x473   : > { %v1114_v20 = vpop.eup %1113 }
 0x474   : > { %v743_v21 = vmul.f32 %v1114_v20, %v738_v18  ;;  %v744_v22 = vmul.f32 %v1114_v20, %v739_v19 }
 0x476   : > { %v747_v23 = vrot.slane %v743_v21, 7  ;;  %v748_v24 = vrot.slane %v744_v22, 7 }
 0x478   : > { %v751_v25 = vsel %vm320_vm2, %v706_v0, %v747_v23  ;;  %v752_v26 = vsel %vm320_vm2, %v708_v3, %v748_v24 }
 0x479   : > { %v755_v27 = vcombine.low %v751_v25, %v752_v26 }
 0x47b   : > { %919 = vst.sshfl [vmem:[%s301_s27] sm:$0x33 pattern:$0x76325410] %v755_v27 }
 0x47c   : > { %1246 = shalt.err (!%p1243_p11)
}
 0x47d   : > { %s1247_s9 = scalar_lea.hbm %s1623_s19, 64  ;;  %s1251_s7 = scalar_lea.hbm %s1671_s4, 128 }
 0x47e   : > { %p1248_p2 = scmp.ne.s32.totalorder %s1623_s19, %s1247_s9  ;;  %p1252_p6 = scmp.lt.u32.totalorder %s1623_s19, %s1671_s4 }
 0x47f   : > { %p1253_p1 = scmp.lt.u32.totalorder %s1251_s7, %s1247_s9  ;;  %p1255_p4 = scmp.lt.u32.totalorder %s1247_s9, %s1623_s19 }
 0x480   : > { %p1249_p13 = pnand %p1248_p2, %p1709_p9 }
 0x481   : > { %p1254_p0 = por %p1253_p1, %p1252_p6 }
 0x482   : > { %p1250_p10 = pneg %p1249_p13 }
 0x483   : > { %p1256_p12 = por %p1255_p4, %p1254_p0 }
 0x485   : > { %p1257_p3 = pnand %p1256_p12, %p1250_p10 }
 0x487   : > { %1260 = shalt.err (!%p1257_p3)
}
 0x488   : > { %1038 = dma.vmem_to_hbm [thread:$0]  (%p1709_p9), %s1625_s10, 64, %s1623_s19, %s766_s13  }
 0x489 PF: > { %s792_s11 = sand.u32 1, %s1295_s15   ;;  %p1710_p8 = scmp.ne.s32.totalorder %s1696_s6, 0 }
 0x48a   : > { %p1711_p5 = scmp.ge.s32.totalorder %s1307_s18, 2  ;;  %s793_s21 = scalar_lea.sflag [#allocation4], %s792_s11 }
 0x48c   : > { %p1055_p7 = pnand %p1711_p5, %p1710_p8 }
 0x48e   : > { %1290 = dma.done.wait (!%p1055_p7), %s793_s21, 64  }
 0x48f   : > { %1292 = vsyncadd (!%p1055_p7), %s793_s21, 4294967232  ;;  %s1712_s18 = sld [smem:[#allocation16_spill]]  ;;  %s1713_s24 = sld [smem:[#allocation15_spill]] }
 0x490   : > { %s1714_s17 = sld [smem:[#allocation17_spill]]  ;;  %s1715_s15 = smov %s1299_s16 }
 0x495   : > { %p21_p11 = scmp.ge.s32.totalorder %s1712_s18, 4   ;;  %s1716_s16 = smov %s1713_s24 }
 0x497   :  { %23 = sbr.rel (!%p21_p11) target bundleno = 10 (0xa), region = 109 }
 0x49e   :  { %798 = vsyncpa [#allocation3], 1 }
 0x49f   :  { %800 = vsyncpa [#allocation3 + $0x1], 1 }
 0x4a0   :  { %801 = vsyncpa [#allocation6], 1 }
 0x4a1   :  { %803 = vsyncpa [#allocation6 + $0x1], 1 }
 0x4a2   :  { %804 = vsyncpa [#allocation9], 1 }
 0x4a3   :  { %805 = vsyncpa [#allocation4], 1 }
 0x4a4   :  { %807 = vsyncpa [#allocation4 + $0x1], 1 }

</bundles_post_ra>
